<compile_context>
chip_gen: v5e
topology: v5e:2x2
jax: 0.10.0
libtpu: 0.0.40
codegen_flags: <defaults>
</compile_context>

<pallas_src>
import functools
import math

import jax
import jax.numpy as jnp
from jax.experimental import pallas as pl
from jax.experimental.pallas import tpu as pltpu


# ----------------------------------------------------------------------------
# Kernel: full decoder layer + head for one batch tile. All weights arrive
# pre-transposed / pre-split; 1-D params arrive as (1, N) rows.
# ----------------------------------------------------------------------------
def decoder_kernel(
    x_ref, cross_ref,
    sa_qw_ref, sa_kw_ref, sa_vw_ref, sa_qb_ref, sa_kb_ref, sa_vb_ref,
    sa_ow_ref, sa_ob_ref,
    ca_qw_ref, ca_kw_ref, ca_vw_ref, ca_qb_ref, ca_kb_ref, ca_vb_ref,
    ca_ow_ref, ca_ob_ref,
    n1_g_ref, n1_b_ref, n2_g_ref, n2_b_ref, n3_g_ref, n3_b_ref,
    ff1_w_ref, ff1_b_ref, ff2_w_ref, ff2_b_ref,
    pred_w_ref, pred_b_ref,
    dec_out_ref, pred_ref,
    *, n_heads,
):
    eps = 1e-5
    bt, lt, d = x_ref.shape
    _, ls, _ = cross_ref.shape
    dh = d // n_heads
    n_rows = bt * lt
    m_rows = bt * ls

    # Hoist small (1, N) params into locals once (JAX does not CSE broadcasts).
    n1_g, n1_b = n1_g_ref[...], n1_b_ref[...]
    n2_g, n2_b = n2_g_ref[...], n2_b_ref[...]
    n3_g, n3_b = n3_g_ref[...], n3_b_ref[...]

    def layer_norm(h, g, b):
        mu = jnp.mean(h, axis=-1, keepdims=True)
        var = jnp.mean(jnp.square(h - mu), axis=-1, keepdims=True)
        return (h - mu) * jax.lax.rsqrt(var + eps) * g + b

    def mha(q_in2, kv_in2, lq, lk,
            qw_ref, kw_ref, vw_ref, qb_ref, kb_ref, vb_ref, ow_ref, ob_ref):
        # q_in2: (bt*lq, d), kv_in2: (bt*lk, d) -- batch folded into rows so the
        # projection matmuls have a real M dimension for the MXU.
        q = jnp.dot(q_in2, qw_ref[...], preferred_element_type=jnp.float32) + qb_ref[...]
        k = jnp.dot(kv_in2, kw_ref[...], preferred_element_type=jnp.float32) + kb_ref[...]
        v = jnp.dot(kv_in2, vw_ref[...], preferred_element_type=jnp.float32) + vb_ref[...]
        scale = 1.0 / math.sqrt(dh)

        acc = jnp.zeros((bt * lq, d), jnp.float32)
        for h in range(n_heads):  # static unroll; each head is batched over the tile
            lo, hi = h * dh, (h + 1) * dh
            qh = (q[:, lo:hi] * scale).reshape(bt, lq, dh)
            kh = k[:, lo:hi].reshape(bt, lk, dh)
            vh = v[:, lo:hi].reshape(bt, lk, dh)
            s = jnp.einsum('bqd,bkd->bqk', qh, kh, preferred_element_type=jnp.float32)
            s = s - jnp.max(s, axis=-1, keepdims=True)
            p = jnp.exp(s)
            denom = jnp.sum(p, axis=-1, keepdims=True)
            inv = pl.reciprocal(denom, approx=True)        # EUP seed (free slot)
            inv = inv * (2.0 - denom * inv)                # Newton refine -> f32 accuracy
            inv = inv * (2.0 - denom * inv)
            p = p * inv
            oh = jnp.einsum('bqk,bkd->bqd', p, vh, preferred_element_type=jnp.float32)
            # Accumulate through this head's slice of the output projection
            # (replaces the lane-dim concatenate of dh-wide chunks).
            acc = acc + jnp.dot(oh.reshape(bt * lq, dh), ow_ref[h],
                                preferred_element_type=jnp.float32)
        return acc + ob_ref[...]

    x2 = x_ref[...].reshape(n_rows, d)       # (bt*Lt, d)
    m2 = cross_ref[...].reshape(m_rows, d)   # (bt*Ls, d)

    # --- self-attention block (post-norm, dropout = identity) ---
    sa = mha(x2, x2, lt, lt,
             sa_qw_ref, sa_kw_ref, sa_vw_ref, sa_qb_ref, sa_kb_ref, sa_vb_ref,
             sa_ow_ref, sa_ob_ref)
    h1 = layer_norm(x2 + sa, n1_g, n1_b)

    # --- cross-attention block ---
    ca = mha(h1, m2, lt, ls,
             ca_qw_ref, ca_kw_ref, ca_vw_ref, ca_qb_ref, ca_kb_ref, ca_vb_ref,
             ca_ow_ref, ca_ob_ref)
    h2 = layer_norm(h1 + ca, n2_g, n2_b)

    # --- feed-forward block (ReLU, PyTorch default activation) ---
    ff_h = jnp.maximum(
        jnp.dot(h2, ff1_w_ref[...], preferred_element_type=jnp.float32) + ff1_b_ref[...], 0.0)
    ff = jnp.dot(ff_h, ff2_w_ref[...], preferred_element_type=jnp.float32) + ff2_b_ref[...]
    h3 = layer_norm(h2 + ff, n3_g, n3_b)

    # --- outputs ---
    dec_out_ref[...] = h3.reshape(bt, lt, d)
    pred = jnp.dot(h3, pred_w_ref[...], preferred_element_type=jnp.float32) + pred_b_ref[...]
    pred_ref[...] = pred.reshape(bt, lt, pred_ref.shape[-1])   # lane-dense (padded) store


# ----------------------------------------------------------------------------
# Wrapper
# ----------------------------------------------------------------------------
def _pick_block_b(batch, cap=8):
    """Largest divisor of `batch` <= cap that still leaves >=2 grid steps
    (so the batch-tile axis can be sharded across TensorCores on v7x)."""
    best = 1
    for bb in range(1, min(batch, cap) + 1):
        if batch % bb == 0 and (batch // bb) >= 2:
            best = bb
    return best


def decoder_block_forward(x, cross, params, n_heads, *, block_b=None):
    B, Lt, d = x.shape
    _, Ls, _ = cross.shape
    assert d % n_heads == 0
    H = n_heads
    dh = d // H
    seg_len = params["pred_w"].shape[0]
    d_ff = params["ff1_w"].shape[0]
    segp = ((seg_len + 127) // 128) * 128    # lane-dense prediction output width

    if block_b is None:
        block_b = _pick_block_b(B)
    assert B % block_b == 0
    grid = (B // block_b,)

    f32 = jnp.float32

    def row(v):
        return v.reshape(1, -1).astype(f32)

    def split_in_proj(w, b):
        # PyTorch fused in_proj rows: [0:d]=Q, [d:2d]=K, [2d:3d]=V. Split + transpose host-side.
        return (w[0:d].T.astype(f32), w[d:2 * d].T.astype(f32), w[2 * d:3 * d].T.astype(f32),
                row(b[0:d]), row(b[d:2 * d]), row(b[2 * d:3 * d]))

    sa_qw, sa_kw, sa_vw, sa_qb, sa_kb, sa_vb = split_in_proj(params["sa_in_w"], params["sa_in_b"])
    ca_qw, ca_kw, ca_vw, ca_qb, ca_kb, ca_vb = split_in_proj(params["ca_in_w"], params["ca_in_b"])
    sa_ow = params["sa_out_w"].T.reshape(H, dh, d).astype(f32)   # per-head out-proj slices
    ca_ow = params["ca_out_w"].T.reshape(H, dh, d).astype(f32)

    pred_wt = jnp.pad(params["pred_w"].T.astype(f32), ((0, 0), (0, segp - seg_len)))
    pred_bp = jnp.pad(row(params["pred_b"]), ((0, 0), (0, segp - seg_len)))

    args = [
        x.astype(f32), cross.astype(f32),
        sa_qw, sa_kw, sa_vw, sa_qb, sa_kb, sa_vb, sa_ow, row(params["sa_out_b"]),
        ca_qw, ca_kw, ca_vw, ca_qb, ca_kb, ca_vb, ca_ow, row(params["ca_out_b"]),
        row(params["n1_g"]), row(params["n1_b"]),
        row(params["n2_g"]), row(params["n2_b"]),
        row(params["n3_g"]), row(params["n3_b"]),
        params["ff1_w"].T.astype(f32), row(params["ff1_b"]),
        params["ff2_w"].T.astype(f32), row(params["ff2_b"]),
        pred_wt, pred_bp,
    ]

    def const_spec(a):
        nd = a.ndim
        return pl.BlockSpec(a.shape, lambda b, _nd=nd: (0,) * _nd)

    in_specs = [
        pl.BlockSpec((block_b, Lt, d), lambda b: (b, 0, 0)),
        pl.BlockSpec((block_b, Ls, d), lambda b: (b, 0, 0)),
    ] + [const_spec(a) for a in args[2:]]

    out_specs = [
        pl.BlockSpec((block_b, Lt, d), lambda b: (b, 0, 0)),
        pl.BlockSpec((block_b, Lt, segp), lambda b: (b, 0, 0)),
    ]
    out_shape = (
        jax.ShapeDtypeStruct((B, Lt, d), f32),
        jax.ShapeDtypeStruct((B, Lt, segp), f32),
    )

    # --- VMEM budget (inputs/outputs are double-buffered by the pipeline).
    # Weights keep the same block index every step, so they are fetched once. ---
    weight_bytes = sum(int(a.size) * a.dtype.itemsize for a in args[2:])
    act_bytes = 4 * block_b * (2 * Lt * d + Ls * d + Lt * segp)
    vmem_limit = int(min(64 << 20,                       # valid on v7x (64 MiB VMEM)
                         max(32 << 20, weight_bytes + 2 * act_bytes + (8 << 20))))

    flops = B * (
        6 * Lt * d * d                       # self-attn QKV proj
        + 4 * Lt * Lt * d                    # self-attn scores + AV
        + 2 * Lt * d * d                     # self-attn out proj
        + 2 * Lt * d * d + 4 * Ls * d * d    # cross-attn Q + KV proj
        + 4 * Lt * Ls * d                    # cross-attn scores + AV
        + 2 * Lt * d * d                     # cross-attn out proj
        + 4 * Lt * d * d_ff                  # FFN
        + 2 * Lt * d * segp                  # prediction head
    )
    transcendentals = B * (H * (Lt * Lt + Lt * Ls) + Lt * (3 + 2 * H))
    bytes_accessed = (int(x.size) + int(cross.size)) * 4 \
        + (B * Lt * d + B * Lt * segp) * 4 + weight_bytes

    kernel = functools.partial(decoder_kernel, n_heads=n_heads)
    dec_out, pred_padded = pl.pallas_call(
        kernel,
        grid=grid,
        in_specs=in_specs,
        out_specs=out_specs,
        out_shape=out_shape,
        compiler_params=pltpu.CompilerParams(
            dimension_semantics=("parallel",),
            vmem_limit_bytes=vmem_limit,
        ),
        cost_estimate=pl.CostEstimate(
            flops=int(flops),
            transcendentals=int(transcendentals),
            bytes_accessed=int(bytes_accessed),
        ),
    )(*args)
    return dec_out, pred_padded[..., :seg_len]


# ----------------------------------------------------------------------------
# Pure-JAX reference (mirrors eval-mode nn.TransformerDecoderLayer + Linear)
# ----------------------------------------------------------------------------
def ref_forward(x, cross, params, n_heads):
    def ln(h, g, b):
        mu = h.mean(-1, keepdims=True)
        var = ((h - mu) ** 2).mean(-1, keepdims=True)
        return (h - mu) / jnp.sqrt(var + 1e-5) * g + b

    def mha(q_in, kv_in, in_w, in_b, out_w, out_b):
        d = q_in.shape[-1]
        dh = d // n_heads
        q = q_in @ in_w[:d].T + in_b[:d]
        k = kv_in @ in_w[d:2 * d].T + in_b[d:2 * d]
        v = kv_in @ in_w[2 * d:].T + in_b[2 * d:]
        B, Lq, _ = q.shape
        Lk = k.shape[1]
        q = q.reshape(B, Lq, n_heads, dh).transpose(0, 2, 1, 3)
        k = k.reshape(B, Lk, n_heads, dh).transpose(0, 2, 1, 3)
        v = v.reshape(B, Lk, n_heads, dh).transpose(0, 2, 1, 3)
        s = jnp.einsum("bhqd,bhkd->bhqk", q, k) / jnp.sqrt(jnp.float32(dh))
        p = jax.nn.softmax(s, axis=-1)
        o = jnp.einsum("bhqk,bhkd->bhqd", p, v).transpose(0, 2, 1, 3).reshape(B, Lq, d)
        return o @ out_w.T + out_b

    sa = mha(x, x, params["sa_in_w"], params["sa_in_b"], params["sa_out_w"], params["sa_out_b"])
    h1 = ln(x + sa, params["n1_g"], params["n1_b"])
    ca = mha(h1, cross, params["ca_in_w"], params["ca_in_b"], params["ca_out_w"], params["ca_out_b"])
    h2 = ln(h1 + ca, params["n2_g"], params["n2_b"])
    ff = jax.nn.relu(h2 @ params["ff1_w"].T + params["ff1_b"]) @ params["ff2_w"].T + params["ff2_b"]
    h3 = ln(h2 + ff, params["n3_g"], params["n3_b"])
    return h3, h3 @ params["pred_w"].T + params["pred_b"]


def make_params(key, d_seg, n_heads, d_ff, seg_len):
    ks = jax.random.split(key, 16)
    f32 = jnp.float32
    s = 0.1
    return {
        "sa_in_w":  s * jax.random.normal(ks[0], (3 * d_seg, d_seg), f32),
        "sa_in_b":  s * jax.random.normal(ks[1], (3 * d_seg,), f32),
        "sa_out_w": s * jax.random.normal(ks[2], (d_seg, d_seg), f32),
        "sa_out_b": s * jax.random.normal(ks[3], (d_seg,), f32),
        "ca_in_w":  s * jax.random.normal(ks[4], (3 * d_seg, d_seg), f32),
        "ca_in_b":  s * jax.random.normal(ks[5], (3 * d_seg,), f32),
        "ca_out_w": s * jax.random.normal(ks[6], (d_seg, d_seg), f32),
        "ca_out_b": s * jax.random.normal(ks[7], (d_seg,), f32),
        "n1_g": jnp.ones((d_seg,), f32), "n1_b": jnp.zeros((d_seg,), f32),
        "n2_g": jnp.ones((d_seg,), f32), "n2_b": jnp.zeros((d_seg,), f32),
        "n3_g": jnp.ones((d_seg,), f32), "n3_b": jnp.zeros((d_seg,), f32),
        "ff1_w": s * jax.random.normal(ks[8], (d_ff, d_seg), f32),
        "ff1_b": s * jax.random.normal(ks[9], (d_ff,), f32),
        "ff2_w": s * jax.random.normal(ks[10], (d_seg, d_ff), f32),
        "ff2_b": s * jax.random.normal(ks[11], (d_seg,), f32),
        "pred_w": s * jax.random.normal(ks[12], (seg_len, d_seg), f32),
        "pred_b": s * jax.random.normal(ks[13], (seg_len,), f32),
    }


if __name__ == "__main__":
    # Small shapes consistent with DecoderBlock(seg_len, d_seg, n_heads, d_ff, ...)
    B, L_tgt, L_src = 2, 8, 8
    d_seg, n_heads, d_ff, seg_len = 32, 4, 64, 16

    key = jax.random.PRNGKey(0)
    kx, kc, kp = jax.random.split(key, 3)
    x = jax.random.normal(kx, (B, L_tgt, d_seg), jnp.float32)
    cross = jax.random.normal(kc, (B, L_src, d_seg), jnp.float32)
    params = make_params(kp, d_seg, n_heads, d_ff, seg_len)

    dec_out, layer_predict = decoder_block_forward(x, cross, params, n_heads)
    jax.block_until_ready((dec_out, layer_predict))

    dec_ref, pred_ref_ = ref_forward(x, cross, params, n_heads)
    assert dec_out.shape == dec_ref.shape and layer_predict.shape == pred_ref_.shape
    # 2e-4 tolerance: per-head accumulation order + EUP-seeded (Newton-refined)
    # softmax reciprocal differ from the reference only at float32 rounding level.
    assert jnp.allclose(dec_out, dec_ref, atol=2e-4, rtol=2e-4), "dec_out mismatch"
    assert jnp.allclose(layer_predict, pred_ref_, atol=2e-4, rtol=2e-4), "pred mismatch"

    print("KERNEL_OK")
</pallas_src>

<mosaic_0001>
module attributes {stable_mosaic.version = 11 : i64} {
  func.func @decoder_kernel(%arg0: i32, %arg1: memref<1x8x32xf32, #tpu.memory_space<vmem>>, %arg2: memref<1x8x32xf32, #tpu.memory_space<vmem>>, %arg3: memref<32x32xf32, #tpu.memory_space<vmem>>, %arg4: memref<32x32xf32, #tpu.memory_space<vmem>>, %arg5: memref<32x32xf32, #tpu.memory_space<vmem>>, %arg6: memref<1x32xf32, #tpu.memory_space<vmem>>, %arg7: memref<1x32xf32, #tpu.memory_space<vmem>>, %arg8: memref<1x32xf32, #tpu.memory_space<vmem>>, %arg9: memref<4x8x32xf32, #tpu.memory_space<vmem>>, %arg10: memref<1x32xf32, #tpu.memory_space<vmem>>, %arg11: memref<32x32xf32, #tpu.memory_space<vmem>>, %arg12: memref<32x32xf32, #tpu.memory_space<vmem>>, %arg13: memref<32x32xf32, #tpu.memory_space<vmem>>, %arg14: memref<1x32xf32, #tpu.memory_space<vmem>>, %arg15: memref<1x32xf32, #tpu.memory_space<vmem>>, %arg16: memref<1x32xf32, #tpu.memory_space<vmem>>, %arg17: memref<4x8x32xf32, #tpu.memory_space<vmem>>, %arg18: memref<1x32xf32, #tpu.memory_space<vmem>>, %arg19: memref<1x32xf32, #tpu.memory_space<vmem>>, %arg20: memref<1x32xf32, #tpu.memory_space<vmem>>, %arg21: memref<1x32xf32, #tpu.memory_space<vmem>>, %arg22: memref<1x32xf32, #tpu.memory_space<vmem>>, %arg23: memref<1x32xf32, #tpu.memory_space<vmem>>, %arg24: memref<1x32xf32, #tpu.memory_space<vmem>>, %arg25: memref<32x64xf32, #tpu.memory_space<vmem>>, %arg26: memref<1x64xf32, #tpu.memory_space<vmem>>, %arg27: memref<64x32xf32, #tpu.memory_space<vmem>>, %arg28: memref<1x32xf32, #tpu.memory_space<vmem>>, %arg29: memref<32x128xf32, #tpu.memory_space<vmem>>, %arg30: memref<1x128xf32, #tpu.memory_space<vmem>>, %arg31: memref<1x8x32xf32, #tpu.memory_space<vmem>>, %arg32: memref<1x8x128xf32, #tpu.memory_space<vmem>>) attributes {dimension_semantics = [#tpu.dimension_semantics<parallel>], iteration_bounds = array<i64: 2>, scalar_prefetch = 0 : i64, scratch_operands = 0 : i64, tpu.core_type = #tpu.core_type<tc>, window_params = [{transform_indices = @transform_0, window_bounds = array<i64: 1, 8, 32>}, {transform_indices = @transform_1, window_bounds = array<i64: 1, 8, 32>}, {pipeline_mode = #tpu.pipeline_mode<synchronous>, transform_indices = @transform_2, window_bounds = array<i64: 32, 32>}, {pipeline_mode = #tpu.pipeline_mode<synchronous>, transform_indices = @transform_3, window_bounds = array<i64: 32, 32>}, {pipeline_mode = #tpu.pipeline_mode<synchronous>, transform_indices = @transform_4, window_bounds = array<i64: 32, 32>}, {pipeline_mode = #tpu.pipeline_mode<synchronous>, transform_indices = @transform_5, window_bounds = array<i64: 1, 32>}, {pipeline_mode = #tpu.pipeline_mode<synchronous>, transform_indices = @transform_6, window_bounds = array<i64: 1, 32>}, {pipeline_mode = #tpu.pipeline_mode<synchronous>, transform_indices = @transform_7, window_bounds = array<i64: 1, 32>}, {pipeline_mode = #tpu.pipeline_mode<synchronous>, transform_indices = @transform_8, window_bounds = array<i64: 4, 8, 32>}, {pipeline_mode = #tpu.pipeline_mode<synchronous>, transform_indices = @transform_9, window_bounds = array<i64: 1, 32>}, {pipeline_mode = #tpu.pipeline_mode<synchronous>, transform_indices = @transform_10, window_bounds = array<i64: 32, 32>}, {pipeline_mode = #tpu.pipeline_mode<synchronous>, transform_indices = @transform_11, window_bounds = array<i64: 32, 32>}, {pipeline_mode = #tpu.pipeline_mode<synchronous>, transform_indices = @transform_12, window_bounds = array<i64: 32, 32>}, {pipeline_mode = #tpu.pipeline_mode<synchronous>, transform_indices = @transform_13, window_bounds = array<i64: 1, 32>}, {pipeline_mode = #tpu.pipeline_mode<synchronous>, transform_indices = @transform_14, window_bounds = array<i64: 1, 32>}, {pipeline_mode = #tpu.pipeline_mode<synchronous>, transform_indices = @transform_15, window_bounds = array<i64: 1, 32>}, {pipeline_mode = #tpu.pipeline_mode<synchronous>, transform_indices = @transform_16, window_bounds = array<i64: 4, 8, 32>}, {pipeline_mode = #tpu.pipeline_mode<synchronous>, transform_indices = @transform_17, window_bounds = array<i64: 1, 32>}, {pipeline_mode = #tpu.pipeline_mode<synchronous>, transform_indices = @transform_18, window_bounds = array<i64: 1, 32>}, {pipeline_mode = #tpu.pipeline_mode<synchronous>, transform_indices = @transform_19, window_bounds = array<i64: 1, 32>}, {pipeline_mode = #tpu.pipeline_mode<synchronous>, transform_indices = @transform_20, window_bounds = array<i64: 1, 32>}, {pipeline_mode = #tpu.pipeline_mode<synchronous>, transform_indices = @transform_21, window_bounds = array<i64: 1, 32>}, {pipeline_mode = #tpu.pipeline_mode<synchronous>, transform_indices = @transform_22, window_bounds = array<i64: 1, 32>}, {pipeline_mode = #tpu.pipeline_mode<synchronous>, transform_indices = @transform_23, window_bounds = array<i64: 1, 32>}, {pipeline_mode = #tpu.pipeline_mode<synchronous>, transform_indices = @transform_24, window_bounds = array<i64: 32, 64>}, {pipeline_mode = #tpu.pipeline_mode<synchronous>, transform_indices = @transform_25, window_bounds = array<i64: 1, 64>}, {pipeline_mode = #tpu.pipeline_mode<synchronous>, transform_indices = @transform_26, window_bounds = array<i64: 64, 32>}, {pipeline_mode = #tpu.pipeline_mode<synchronous>, transform_indices = @transform_27, window_bounds = array<i64: 1, 32>}, {pipeline_mode = #tpu.pipeline_mode<synchronous>, transform_indices = @transform_28, window_bounds = array<i64: 32, 128>}, {pipeline_mode = #tpu.pipeline_mode<synchronous>, transform_indices = @transform_29, window_bounds = array<i64: 1, 128>}, {transform_indices = @transform_30, window_bounds = array<i64: 1, 8, 32>}, {transform_indices = @transform_31, window_bounds = array<i64: 1, 8, 128>}]} {
    %c0 = arith.constant 0 : index
    %c0_0 = arith.constant 0 : index
    %0 = vector.load %arg19[%c0, %c0_0] : memref<1x32xf32, #tpu.memory_space<vmem>>, vector<1x32xf32>
    %c0_1 = arith.constant 0 : index
    %c0_2 = arith.constant 0 : index
    %1 = vector.load %arg20[%c0_1, %c0_2] : memref<1x32xf32, #tpu.memory_space<vmem>>, vector<1x32xf32>
    %c0_3 = arith.constant 0 : index
    %c0_4 = arith.constant 0 : index
    %2 = vector.load %arg21[%c0_3, %c0_4] : memref<1x32xf32, #tpu.memory_space<vmem>>, vector<1x32xf32>
    %c0_5 = arith.constant 0 : index
    %c0_6 = arith.constant 0 : index
    %3 = vector.load %arg22[%c0_5, %c0_6] : memref<1x32xf32, #tpu.memory_space<vmem>>, vector<1x32xf32>
    %c0_7 = arith.constant 0 : index
    %c0_8 = arith.constant 0 : index
    %4 = vector.load %arg23[%c0_7, %c0_8] : memref<1x32xf32, #tpu.memory_space<vmem>>, vector<1x32xf32>
    %c0_9 = arith.constant 0 : index
    %c0_10 = arith.constant 0 : index
    %5 = vector.load %arg24[%c0_9, %c0_10] : memref<1x32xf32, #tpu.memory_space<vmem>>, vector<1x32xf32>
    %c0_11 = arith.constant 0 : index
    %c0_12 = arith.constant 0 : index
    %c0_13 = arith.constant 0 : index
    %6 = vector.load %arg1[%c0_11, %c0_12, %c0_13] : memref<1x8x32xf32, #tpu.memory_space<vmem>>, vector<1x8x32xf32>
    %7 = vector.shape_cast %6 : vector<1x8x32xf32> to vector<8x32xf32>
    %c0_14 = arith.constant 0 : index
    %c0_15 = arith.constant 0 : index
    %c0_16 = arith.constant 0 : index
    %8 = vector.load %arg2[%c0_14, %c0_15, %c0_16] : memref<1x8x32xf32, #tpu.memory_space<vmem>>, vector<1x8x32xf32>
    %9 = vector.shape_cast %8 : vector<1x8x32xf32> to vector<8x32xf32>
    %c0_17 = arith.constant 0 : index
    %c0_18 = arith.constant 0 : index
    %10 = vector.load %arg3[%c0_17, %c0_18] : memref<32x32xf32, #tpu.memory_space<vmem>>, vector<32x32xf32>
    %cst = arith.constant dense<0.000000e+00> : vector<8x32xf32>
    %11 = tpu.matmul %7, %10, %cst {dimension_numbers = #tpu.dot_dimension_numbers<[1], [0], [0], [1], [0, 0, 1, 1], [], []>} : vector<8x32xf32>, vector<32x32xf32>, vector<8x32xf32> -> vector<8x32xf32>
    %c0_19 = arith.constant 0 : index
    %c0_20 = arith.constant 0 : index
    %12 = vector.load %arg6[%c0_19, %c0_20] : memref<1x32xf32, #tpu.memory_space<vmem>>, vector<1x32xf32>
    %13 = vector.broadcast %12 : vector<1x32xf32> to vector<8x32xf32>
    %14 = arith.addf %11, %13 : vector<8x32xf32>
    %c0_21 = arith.constant 0 : index
    %c0_22 = arith.constant 0 : index
    %15 = vector.load %arg4[%c0_21, %c0_22] : memref<32x32xf32, #tpu.memory_space<vmem>>, vector<32x32xf32>
    %cst_23 = arith.constant dense<0.000000e+00> : vector<8x32xf32>
    %16 = tpu.matmul %7, %15, %cst_23 {dimension_numbers = #tpu.dot_dimension_numbers<[1], [0], [0], [1], [0, 0, 1, 1], [], []>} : vector<8x32xf32>, vector<32x32xf32>, vector<8x32xf32> -> vector<8x32xf32>
    %c0_24 = arith.constant 0 : index
    %c0_25 = arith.constant 0 : index
    %17 = vector.load %arg7[%c0_24, %c0_25] : memref<1x32xf32, #tpu.memory_space<vmem>>, vector<1x32xf32>
    %18 = vector.broadcast %17 : vector<1x32xf32> to vector<8x32xf32>
    %19 = arith.addf %16, %18 : vector<8x32xf32>
    %c0_26 = arith.constant 0 : index
    %c0_27 = arith.constant 0 : index
    %20 = vector.load %arg5[%c0_26, %c0_27] : memref<32x32xf32, #tpu.memory_space<vmem>>, vector<32x32xf32>
    %cst_28 = arith.constant dense<0.000000e+00> : vector<8x32xf32>
    %21 = tpu.matmul %7, %20, %cst_28 {dimension_numbers = #tpu.dot_dimension_numbers<[1], [0], [0], [1], [0, 0, 1, 1], [], []>} : vector<8x32xf32>, vector<32x32xf32>, vector<8x32xf32> -> vector<8x32xf32>
    %c0_29 = arith.constant 0 : index
    %c0_30 = arith.constant 0 : index
    %22 = vector.load %arg8[%c0_29, %c0_30] : memref<1x32xf32, #tpu.memory_space<vmem>>, vector<1x32xf32>
    %23 = vector.broadcast %22 : vector<1x32xf32> to vector<8x32xf32>
    %24 = arith.addf %21, %23 : vector<8x32xf32>
    %cst_31 = arith.constant 0.000000e+00 : f32
    %25 = vector.broadcast %cst_31 : f32 to vector<8x32xf32>
    %26 = vector.extract_strided_slice %14 {offsets = [0, 0], sizes = [8, 8], strides = [1, 1]} : vector<8x32xf32> to vector<8x8xf32>
    %cst_32 = arith.constant 0.353553385 : f32
    %27 = vector.broadcast %cst_32 : f32 to vector<8x8xf32>
    %28 = arith.mulf %26, %27 : vector<8x8xf32>
    %29 = vector.shape_cast %28 : vector<8x8xf32> to vector<1x8x8xf32>
    %30 = vector.extract_strided_slice %19 {offsets = [0, 0], sizes = [8, 8], strides = [1, 1]} : vector<8x32xf32> to vector<8x8xf32>
    %31 = vector.shape_cast %30 : vector<8x8xf32> to vector<1x8x8xf32>
    %32 = vector.extract_strided_slice %24 {offsets = [0, 0], sizes = [8, 8], strides = [1, 1]} : vector<8x32xf32> to vector<8x8xf32>
    %33 = vector.shape_cast %32 : vector<8x8xf32> to vector<1x8x8xf32>
    "tpu.trace_start"() <{level = 10 : i32, message = "bqd,bkd->bqk"}> : () -> ()
    %cst_33 = arith.constant dense<0.000000e+00> : vector<1x8x8xf32>
    %34 = tpu.matmul %29, %31, %cst_33 {dimension_numbers = #tpu.dot_dimension_numbers<[2], [2], [1], [1], [0, 0, 0, 1, 1, 1], [0], [0]>} : vector<1x8x8xf32>, vector<1x8x8xf32>, vector<1x8x8xf32> -> vector<1x8x8xf32>
    "tpu.trace_stop"() : () -> ()
    %cst_34 = arith.constant dense<0xFF800000> : vector<1x8xf32>
    %35 = vector.multi_reduction <maximumf>, %34, %cst_34 [2] : vector<1x8x8xf32> to vector<1x8xf32>
    %36 = vector.shape_cast %35 : vector<1x8xf32> to vector<1x8x1xf32>
    %37 = vector.broadcast %36 : vector<1x8x1xf32> to vector<1x8x8xf32>
    %38 = arith.subf %34, %37 : vector<1x8x8xf32>
    %39 = math.exp %38 : vector<1x8x8xf32>
    %cst_35 = arith.constant dense<0.000000e+00> : vector<1x8xf32>
    %40 = vector.multi_reduction <add>, %39, %cst_35 [2] : vector<1x8x8xf32> to vector<1x8xf32>
    %41 = vector.shape_cast %40 : vector<1x8xf32> to vector<1x8x1xf32>
    %42 = tpu.reciprocal %41 {approx = true} : vector<1x8x1xf32> -> vector<1x8x1xf32>
    %43 = arith.mulf %41, %42 : vector<1x8x1xf32>
    %cst_36 = arith.constant 2.000000e+00 : f32
    %44 = vector.broadcast %cst_36 : f32 to vector<1x8x1xf32>
    %45 = arith.subf %44, %43 : vector<1x8x1xf32>
    %46 = arith.mulf %42, %45 : vector<1x8x1xf32>
    %47 = arith.mulf %41, %46 : vector<1x8x1xf32>
    %cst_37 = arith.constant 2.000000e+00 : f32
    %48 = vector.broadcast %cst_37 : f32 to vector<1x8x1xf32>
    %49 = arith.subf %48, %47 : vector<1x8x1xf32>
    %50 = arith.mulf %46, %49 : vector<1x8x1xf32>
    %51 = vector.broadcast %50 : vector<1x8x1xf32> to vector<1x8x8xf32>
    %52 = arith.mulf %39, %51 : vector<1x8x8xf32>
    "tpu.trace_start"() <{level = 10 : i32, message = "bqk,bkd->bqd"}> : () -> ()
    %cst_38 = arith.constant dense<0.000000e+00> : vector<1x8x8xf32>
    %53 = tpu.matmul %52, %33, %cst_38 {dimension_numbers = #tpu.dot_dimension_numbers<[2], [1], [1], [2], [0, 0, 0, 1, 1, 2], [0], [0]>} : vector<1x8x8xf32>, vector<1x8x8xf32>, vector<1x8x8xf32> -> vector<1x8x8xf32>
    "tpu.trace_stop"() : () -> ()
    %54 = vector.shape_cast %53 : vector<1x8x8xf32> to vector<8x8xf32>
    %c0_39 = arith.constant 0 : index
    %c0_40 = arith.constant 0 : index
    %c0_41 = arith.constant 0 : index
    %55 = vector.load %arg9[%c0_39, %c0_40, %c0_41] : memref<4x8x32xf32, #tpu.memory_space<vmem>>, vector<1x8x32xf32>
    %56 = vector.shape_cast %55 : vector<1x8x32xf32> to vector<8x32xf32>
    %cst_42 = arith.constant dense<0.000000e+00> : vector<8x32xf32>
    %57 = tpu.matmul %54, %56, %cst_42 {dimension_numbers = #tpu.dot_dimension_numbers<[1], [0], [0], [1], [0, 0, 1, 1], [], []>} : vector<8x8xf32>, vector<8x32xf32>, vector<8x32xf32> -> vector<8x32xf32>
    %58 = arith.addf %25, %57 : vector<8x32xf32>
    %59 = vector.extract_strided_slice %14 {offsets = [0, 8], sizes = [8, 8], strides = [1, 1]} : vector<8x32xf32> to vector<8x8xf32>
    %cst_43 = arith.constant 0.353553385 : f32
    %60 = vector.broadcast %cst_43 : f32 to vector<8x8xf32>
    %61 = arith.mulf %59, %60 : vector<8x8xf32>
    %62 = vector.shape_cast %61 : vector<8x8xf32> to vector<1x8x8xf32>
    %63 = vector.extract_strided_slice %19 {offsets = [0, 8], sizes = [8, 8], strides = [1, 1]} : vector<8x32xf32> to vector<8x8xf32>
    %64 = vector.shape_cast %63 : vector<8x8xf32> to vector<1x8x8xf32>
    %65 = vector.extract_strided_slice %24 {offsets = [0, 8], sizes = [8, 8], strides = [1, 1]} : vector<8x32xf32> to vector<8x8xf32>
    %66 = vector.shape_cast %65 : vector<8x8xf32> to vector<1x8x8xf32>
    "tpu.trace_start"() <{level = 10 : i32, message = "bqd,bkd->bqk"}> : () -> ()
    %cst_44 = arith.constant dense<0.000000e+00> : vector<1x8x8xf32>
    %67 = tpu.matmul %62, %64, %cst_44 {dimension_numbers = #tpu.dot_dimension_numbers<[2], [2], [1], [1], [0, 0, 0, 1, 1, 1], [0], [0]>} : vector<1x8x8xf32>, vector<1x8x8xf32>, vector<1x8x8xf32> -> vector<1x8x8xf32>
    "tpu.trace_stop"() : () -> ()
    %cst_45 = arith.constant dense<0xFF800000> : vector<1x8xf32>
    %68 = vector.multi_reduction <maximumf>, %67, %cst_45 [2] : vector<1x8x8xf32> to vector<1x8xf32>
    %69 = vector.shape_cast %68 : vector<1x8xf32> to vector<1x8x1xf32>
    %70 = vector.broadcast %69 : vector<1x8x1xf32> to vector<1x8x8xf32>
    %71 = arith.subf %67, %70 : vector<1x8x8xf32>
    %72 = math.exp %71 : vector<1x8x8xf32>
    %cst_46 = arith.constant dense<0.000000e+00> : vector<1x8xf32>
    %73 = vector.multi_reduction <add>, %72, %cst_46 [2] : vector<1x8x8xf32> to vector<1x8xf32>
    %74 = vector.shape_cast %73 : vector<1x8xf32> to vector<1x8x1xf32>
    %75 = tpu.reciprocal %74 {approx = true} : vector<1x8x1xf32> -> vector<1x8x1xf32>
    %76 = arith.mulf %74, %75 : vector<1x8x1xf32>
    %cst_47 = arith.constant 2.000000e+00 : f32
    %77 = vector.broadcast %cst_47 : f32 to vector<1x8x1xf32>
    %78 = arith.subf %77, %76 : vector<1x8x1xf32>
    %79 = arith.mulf %75, %78 : vector<1x8x1xf32>
    %80 = arith.mulf %74, %79 : vector<1x8x1xf32>
    %cst_48 = arith.constant 2.000000e+00 : f32
    %81 = vector.broadcast %cst_48 : f32 to vector<1x8x1xf32>
    %82 = arith.subf %81, %80 : vector<1x8x1xf32>
    %83 = arith.mulf %79, %82 : vector<1x8x1xf32>
    %84 = vector.broadcast %83 : vector<1x8x1xf32> to vector<1x8x8xf32>
    %85 = arith.mulf %72, %84 : vector<1x8x8xf32>
    "tpu.trace_start"() <{level = 10 : i32, message = "bqk,bkd->bqd"}> : () -> ()
    %cst_49 = arith.constant dense<0.000000e+00> : vector<1x8x8xf32>
    %86 = tpu.matmul %85, %66, %cst_49 {dimension_numbers = #tpu.dot_dimension_numbers<[2], [1], [1], [2], [0, 0, 0, 1, 1, 2], [0], [0]>} : vector<1x8x8xf32>, vector<1x8x8xf32>, vector<1x8x8xf32> -> vector<1x8x8xf32>
    "tpu.trace_stop"() : () -> ()
    %87 = vector.shape_cast %86 : vector<1x8x8xf32> to vector<8x8xf32>
    %c1 = arith.constant 1 : index
    %c0_50 = arith.constant 0 : index
    %c0_51 = arith.constant 0 : index
    %88 = vector.load %arg9[%c1, %c0_50, %c0_51] : memref<4x8x32xf32, #tpu.memory_space<vmem>>, vector<1x8x32xf32>
    %89 = vector.shape_cast %88 : vector<1x8x32xf32> to vector<8x32xf32>
    %cst_52 = arith.constant dense<0.000000e+00> : vector<8x32xf32>
    %90 = tpu.matmul %87, %89, %cst_52 {dimension_numbers = #tpu.dot_dimension_numbers<[1], [0], [0], [1], [0, 0, 1, 1], [], []>} : vector<8x8xf32>, vector<8x32xf32>, vector<8x32xf32> -> vector<8x32xf32>
    %91 = arith.addf %58, %90 : vector<8x32xf32>
    %92 = vector.extract_strided_slice %14 {offsets = [0, 16], sizes = [8, 8], strides = [1, 1]} : vector<8x32xf32> to vector<8x8xf32>
    %cst_53 = arith.constant 0.353553385 : f32
    %93 = vector.broadcast %cst_53 : f32 to vector<8x8xf32>
    %94 = arith.mulf %92, %93 : vector<8x8xf32>
    %95 = vector.shape_cast %94 : vector<8x8xf32> to vector<1x8x8xf32>
    %96 = vector.extract_strided_slice %19 {offsets = [0, 16], sizes = [8, 8], strides = [1, 1]} : vector<8x32xf32> to vector<8x8xf32>
    %97 = vector.shape_cast %96 : vector<8x8xf32> to vector<1x8x8xf32>
    %98 = vector.extract_strided_slice %24 {offsets = [0, 16], sizes = [8, 8], strides = [1, 1]} : vector<8x32xf32> to vector<8x8xf32>
    %99 = vector.shape_cast %98 : vector<8x8xf32> to vector<1x8x8xf32>
    "tpu.trace_start"() <{level = 10 : i32, message = "bqd,bkd->bqk"}> : () -> ()
    %cst_54 = arith.constant dense<0.000000e+00> : vector<1x8x8xf32>
    %100 = tpu.matmul %95, %97, %cst_54 {dimension_numbers = #tpu.dot_dimension_numbers<[2], [2], [1], [1], [0, 0, 0, 1, 1, 1], [0], [0]>} : vector<1x8x8xf32>, vector<1x8x8xf32>, vector<1x8x8xf32> -> vector<1x8x8xf32>
    "tpu.trace_stop"() : () -> ()
    %cst_55 = arith.constant dense<0xFF800000> : vector<1x8xf32>
    %101 = vector.multi_reduction <maximumf>, %100, %cst_55 [2] : vector<1x8x8xf32> to vector<1x8xf32>
    %102 = vector.shape_cast %101 : vector<1x8xf32> to vector<1x8x1xf32>
    %103 = vector.broadcast %102 : vector<1x8x1xf32> to vector<1x8x8xf32>
    %104 = arith.subf %100, %103 : vector<1x8x8xf32>
    %105 = math.exp %104 : vector<1x8x8xf32>
    %cst_56 = arith.constant dense<0.000000e+00> : vector<1x8xf32>
    %106 = vector.multi_reduction <add>, %105, %cst_56 [2] : vector<1x8x8xf32> to vector<1x8xf32>
    %107 = vector.shape_cast %106 : vector<1x8xf32> to vector<1x8x1xf32>
    %108 = tpu.reciprocal %107 {approx = true} : vector<1x8x1xf32> -> vector<1x8x1xf32>
    %109 = arith.mulf %107, %108 : vector<1x8x1xf32>
    %cst_57 = arith.constant 2.000000e+00 : f32
    %110 = vector.broadcast %cst_57 : f32 to vector<1x8x1xf32>
    %111 = arith.subf %110, %109 : vector<1x8x1xf32>
    %112 = arith.mulf %108, %111 : vector<1x8x1xf32>
    %113 = arith.mulf %107, %112 : vector<1x8x1xf32>
    %cst_58 = arith.constant 2.000000e+00 : f32
    %114 = vector.broadcast %cst_58 : f32 to vector<1x8x1xf32>
    %115 = arith.subf %114, %113 : vector<1x8x1xf32>
    %116 = arith.mulf %112, %115 : vector<1x8x1xf32>
    %117 = vector.broadcast %116 : vector<1x8x1xf32> to vector<1x8x8xf32>
    %118 = arith.mulf %105, %117 : vector<1x8x8xf32>
    "tpu.trace_start"() <{level = 10 : i32, message = "bqk,bkd->bqd"}> : () -> ()
    %cst_59 = arith.constant dense<0.000000e+00> : vector<1x8x8xf32>
    %119 = tpu.matmul %118, %99, %cst_59 {dimension_numbers = #tpu.dot_dimension_numbers<[2], [1], [1], [2], [0, 0, 0, 1, 1, 2], [0], [0]>} : vector<1x8x8xf32>, vector<1x8x8xf32>, vector<1x8x8xf32> -> vector<1x8x8xf32>
    "tpu.trace_stop"() : () -> ()
    %120 = vector.shape_cast %119 : vector<1x8x8xf32> to vector<8x8xf32>
    %c2 = arith.constant 2 : index
    %c0_60 = arith.constant 0 : index
    %c0_61 = arith.constant 0 : index
    %121 = vector.load %arg9[%c2, %c0_60, %c0_61] : memref<4x8x32xf32, #tpu.memory_space<vmem>>, vector<1x8x32xf32>
    %122 = vector.shape_cast %121 : vector<1x8x32xf32> to vector<8x32xf32>
    %cst_62 = arith.constant dense<0.000000e+00> : vector<8x32xf32>
    %123 = tpu.matmul %120, %122, %cst_62 {dimension_numbers = #tpu.dot_dimension_numbers<[1], [0], [0], [1], [0, 0, 1, 1], [], []>} : vector<8x8xf32>, vector<8x32xf32>, vector<8x32xf32> -> vector<8x32xf32>
    %124 = arith.addf %91, %123 : vector<8x32xf32>
    %125 = vector.extract_strided_slice %14 {offsets = [0, 24], sizes = [8, 8], strides = [1, 1]} : vector<8x32xf32> to vector<8x8xf32>
    %cst_63 = arith.constant 0.353553385 : f32
    %126 = vector.broadcast %cst_63 : f32 to vector<8x8xf32>
    %127 = arith.mulf %125, %126 : vector<8x8xf32>
    %128 = vector.shape_cast %127 : vector<8x8xf32> to vector<1x8x8xf32>
    %129 = vector.extract_strided_slice %19 {offsets = [0, 24], sizes = [8, 8], strides = [1, 1]} : vector<8x32xf32> to vector<8x8xf32>
    %130 = vector.shape_cast %129 : vector<8x8xf32> to vector<1x8x8xf32>
    %131 = vector.extract_strided_slice %24 {offsets = [0, 24], sizes = [8, 8], strides = [1, 1]} : vector<8x32xf32> to vector<8x8xf32>
    %132 = vector.shape_cast %131 : vector<8x8xf32> to vector<1x8x8xf32>
    "tpu.trace_start"() <{level = 10 : i32, message = "bqd,bkd->bqk"}> : () -> ()
    %cst_64 = arith.constant dense<0.000000e+00> : vector<1x8x8xf32>
    %133 = tpu.matmul %128, %130, %cst_64 {dimension_numbers = #tpu.dot_dimension_numbers<[2], [2], [1], [1], [0, 0, 0, 1, 1, 1], [0], [0]>} : vector<1x8x8xf32>, vector<1x8x8xf32>, vector<1x8x8xf32> -> vector<1x8x8xf32>
    "tpu.trace_stop"() : () -> ()
    %cst_65 = arith.constant dense<0xFF800000> : vector<1x8xf32>
    %134 = vector.multi_reduction <maximumf>, %133, %cst_65 [2] : vector<1x8x8xf32> to vector<1x8xf32>
    %135 = vector.shape_cast %134 : vector<1x8xf32> to vector<1x8x1xf32>
    %136 = vector.broadcast %135 : vector<1x8x1xf32> to vector<1x8x8xf32>
    %137 = arith.subf %133, %136 : vector<1x8x8xf32>
    %138 = math.exp %137 : vector<1x8x8xf32>
    %cst_66 = arith.constant dense<0.000000e+00> : vector<1x8xf32>
    %139 = vector.multi_reduction <add>, %138, %cst_66 [2] : vector<1x8x8xf32> to vector<1x8xf32>
    %140 = vector.shape_cast %139 : vector<1x8xf32> to vector<1x8x1xf32>
    %141 = tpu.reciprocal %140 {approx = true} : vector<1x8x1xf32> -> vector<1x8x1xf32>
    %142 = arith.mulf %140, %141 : vector<1x8x1xf32>
    %cst_67 = arith.constant 2.000000e+00 : f32
    %143 = vector.broadcast %cst_67 : f32 to vector<1x8x1xf32>
    %144 = arith.subf %143, %142 : vector<1x8x1xf32>
    %145 = arith.mulf %141, %144 : vector<1x8x1xf32>
    %146 = arith.mulf %140, %145 : vector<1x8x1xf32>
    %cst_68 = arith.constant 2.000000e+00 : f32
    %147 = vector.broadcast %cst_68 : f32 to vector<1x8x1xf32>
    %148 = arith.subf %147, %146 : vector<1x8x1xf32>
    %149 = arith.mulf %145, %148 : vector<1x8x1xf32>
    %150 = vector.broadcast %149 : vector<1x8x1xf32> to vector<1x8x8xf32>
    %151 = arith.mulf %138, %150 : vector<1x8x8xf32>
    "tpu.trace_start"() <{level = 10 : i32, message = "bqk,bkd->bqd"}> : () -> ()
    %cst_69 = arith.constant dense<0.000000e+00> : vector<1x8x8xf32>
    %152 = tpu.matmul %151, %132, %cst_69 {dimension_numbers = #tpu.dot_dimension_numbers<[2], [1], [1], [2], [0, 0, 0, 1, 1, 2], [0], [0]>} : vector<1x8x8xf32>, vector<1x8x8xf32>, vector<1x8x8xf32> -> vector<1x8x8xf32>
    "tpu.trace_stop"() : () -> ()
    %153 = vector.shape_cast %152 : vector<1x8x8xf32> to vector<8x8xf32>
    %c3 = arith.constant 3 : index
    %c0_70 = arith.constant 0 : index
    %c0_71 = arith.constant 0 : index
    %154 = vector.load %arg9[%c3, %c0_70, %c0_71] : memref<4x8x32xf32, #tpu.memory_space<vmem>>, vector<1x8x32xf32>
    %155 = vector.shape_cast %154 : vector<1x8x32xf32> to vector<8x32xf32>
    %cst_72 = arith.constant dense<0.000000e+00> : vector<8x32xf32>
    %156 = tpu.matmul %153, %155, %cst_72 {dimension_numbers = #tpu.dot_dimension_numbers<[1], [0], [0], [1], [0, 0, 1, 1], [], []>} : vector<8x8xf32>, vector<8x32xf32>, vector<8x32xf32> -> vector<8x32xf32>
    %157 = arith.addf %124, %156 : vector<8x32xf32>
    %c0_73 = arith.constant 0 : index
    %c0_74 = arith.constant 0 : index
    %158 = vector.load %arg10[%c0_73, %c0_74] : memref<1x32xf32, #tpu.memory_space<vmem>>, vector<1x32xf32>
    %159 = vector.broadcast %158 : vector<1x32xf32> to vector<8x32xf32>
    %160 = arith.addf %157, %159 : vector<8x32xf32>
    %161 = arith.addf %7, %160 : vector<8x32xf32>
    %cst_75 = arith.constant dense<0.000000e+00> : vector<8xf32>
    %162 = vector.multi_reduction <add>, %161, %cst_75 [1] : vector<8x32xf32> to vector<8xf32>
    %163 = vector.shape_cast %162 : vector<8xf32> to vector<8x1xf32>
    %cst_76 = arith.constant 3.200000e+01 : f32
    %164 = vector.broadcast %cst_76 : f32 to vector<8x1xf32>
    %165 = arith.divf %163, %164 : vector<8x1xf32>
    %166 = vector.broadcast %165 : vector<8x1xf32> to vector<8x32xf32>
    %167 = arith.subf %161, %166 : vector<8x32xf32>
    %168 = arith.mulf %167, %167 : vector<8x32xf32>
    %cst_77 = arith.constant dense<0.000000e+00> : vector<8xf32>
    %169 = vector.multi_reduction <add>, %168, %cst_77 [1] : vector<8x32xf32> to vector<8xf32>
    %170 = vector.shape_cast %169 : vector<8xf32> to vector<8x1xf32>
    %cst_78 = arith.constant 3.200000e+01 : f32
    %171 = vector.broadcast %cst_78 : f32 to vector<8x1xf32>
    %172 = arith.divf %170, %171 : vector<8x1xf32>
    %173 = vector.broadcast %165 : vector<8x1xf32> to vector<8x32xf32>
    %174 = arith.subf %161, %173 : vector<8x32xf32>
    %cst_79 = arith.constant 9.99999974E-6 : f32
    %175 = vector.broadcast %cst_79 : f32 to vector<8x1xf32>
    %176 = arith.addf %172, %175 : vector<8x1xf32>
    %177 = math.rsqrt %176 : vector<8x1xf32>
    %178 = vector.broadcast %177 : vector<8x1xf32> to vector<8x32xf32>
    %179 = arith.mulf %174, %178 : vector<8x32xf32>
    %180 = vector.broadcast %0 : vector<1x32xf32> to vector<8x32xf32>
    %181 = arith.mulf %179, %180 : vector<8x32xf32>
    %182 = vector.broadcast %1 : vector<1x32xf32> to vector<8x32xf32>
    %183 = arith.addf %181, %182 : vector<8x32xf32>
    %c0_80 = arith.constant 0 : index
    %c0_81 = arith.constant 0 : index
    %184 = vector.load %arg11[%c0_80, %c0_81] : memref<32x32xf32, #tpu.memory_space<vmem>>, vector<32x32xf32>
    %cst_82 = arith.constant dense<0.000000e+00> : vector<8x32xf32>
    %185 = tpu.matmul %183, %184, %cst_82 {dimension_numbers = #tpu.dot_dimension_numbers<[1], [0], [0], [1], [0, 0, 1, 1], [], []>} : vector<8x32xf32>, vector<32x32xf32>, vector<8x32xf32> -> vector<8x32xf32>
    %c0_83 = arith.constant 0 : index
    %c0_84 = arith.constant 0 : index
    %186 = vector.load %arg14[%c0_83, %c0_84] : memref<1x32xf32, #tpu.memory_space<vmem>>, vector<1x32xf32>
    %187 = vector.broadcast %186 : vector<1x32xf32> to vector<8x32xf32>
    %188 = arith.addf %185, %187 : vector<8x32xf32>
    %c0_85 = arith.constant 0 : index
    %c0_86 = arith.constant 0 : index
    %189 = vector.load %arg12[%c0_85, %c0_86] : memref<32x32xf32, #tpu.memory_space<vmem>>, vector<32x32xf32>
    %cst_87 = arith.constant dense<0.000000e+00> : vector<8x32xf32>
    %190 = tpu.matmul %9, %189, %cst_87 {dimension_numbers = #tpu.dot_dimension_numbers<[1], [0], [0], [1], [0, 0, 1, 1], [], []>} : vector<8x32xf32>, vector<32x32xf32>, vector<8x32xf32> -> vector<8x32xf32>
    %c0_88 = arith.constant 0 : index
    %c0_89 = arith.constant 0 : index
    %191 = vector.load %arg15[%c0_88, %c0_89] : memref<1x32xf32, #tpu.memory_space<vmem>>, vector<1x32xf32>
    %192 = vector.broadcast %191 : vector<1x32xf32> to vector<8x32xf32>
    %193 = arith.addf %190, %192 : vector<8x32xf32>
    %c0_90 = arith.constant 0 : index
    %c0_91 = arith.constant 0 : index
    %194 = vector.load %arg13[%c0_90, %c0_91] : memref<32x32xf32, #tpu.memory_space<vmem>>, vector<32x32xf32>
    %cst_92 = arith.constant dense<0.000000e+00> : vector<8x32xf32>
    %195 = tpu.matmul %9, %194, %cst_92 {dimension_numbers = #tpu.dot_dimension_numbers<[1], [0], [0], [1], [0, 0, 1, 1], [], []>} : vector<8x32xf32>, vector<32x32xf32>, vector<8x32xf32> -> vector<8x32xf32>
    %c0_93 = arith.constant 0 : index
    %c0_94 = arith.constant 0 : index
    %196 = vector.load %arg16[%c0_93, %c0_94] : memref<1x32xf32, #tpu.memory_space<vmem>>, vector<1x32xf32>
    %197 = vector.broadcast %196 : vector<1x32xf32> to vector<8x32xf32>
    %198 = arith.addf %195, %197 : vector<8x32xf32>
    %cst_95 = arith.constant 0.000000e+00 : f32
    %199 = vector.broadcast %cst_95 : f32 to vector<8x32xf32>
    %200 = vector.extract_strided_slice %188 {offsets = [0, 0], sizes = [8, 8], strides = [1, 1]} : vector<8x32xf32> to vector<8x8xf32>
    %cst_96 = arith.constant 0.353553385 : f32
    %201 = vector.broadcast %cst_96 : f32 to vector<8x8xf32>
    %202 = arith.mulf %200, %201 : vector<8x8xf32>
    %203 = vector.shape_cast %202 : vector<8x8xf32> to vector<1x8x8xf32>
    %204 = vector.extract_strided_slice %193 {offsets = [0, 0], sizes = [8, 8], strides = [1, 1]} : vector<8x32xf32> to vector<8x8xf32>
    %205 = vector.shape_cast %204 : vector<8x8xf32> to vector<1x8x8xf32>
    %206 = vector.extract_strided_slice %198 {offsets = [0, 0], sizes = [8, 8], strides = [1, 1]} : vector<8x32xf32> to vector<8x8xf32>
    %207 = vector.shape_cast %206 : vector<8x8xf32> to vector<1x8x8xf32>
    "tpu.trace_start"() <{level = 10 : i32, message = "bqd,bkd->bqk"}> : () -> ()
    %cst_97 = arith.constant dense<0.000000e+00> : vector<1x8x8xf32>
    %208 = tpu.matmul %203, %205, %cst_97 {dimension_numbers = #tpu.dot_dimension_numbers<[2], [2], [1], [1], [0, 0, 0, 1, 1, 1], [0], [0]>} : vector<1x8x8xf32>, vector<1x8x8xf32>, vector<1x8x8xf32> -> vector<1x8x8xf32>
    "tpu.trace_stop"() : () -> ()
    %cst_98 = arith.constant dense<0xFF800000> : vector<1x8xf32>
    %209 = vector.multi_reduction <maximumf>, %208, %cst_98 [2] : vector<1x8x8xf32> to vector<1x8xf32>
    %210 = vector.shape_cast %209 : vector<1x8xf32> to vector<1x8x1xf32>
    %211 = vector.broadcast %210 : vector<1x8x1xf32> to vector<1x8x8xf32>
    %212 = arith.subf %208, %211 : vector<1x8x8xf32>
    %213 = math.exp %212 : vector<1x8x8xf32>
    %cst_99 = arith.constant dense<0.000000e+00> : vector<1x8xf32>
    %214 = vector.multi_reduction <add>, %213, %cst_99 [2] : vector<1x8x8xf32> to vector<1x8xf32>
    %215 = vector.shape_cast %214 : vector<1x8xf32> to vector<1x8x1xf32>
    %216 = tpu.reciprocal %215 {approx = true} : vector<1x8x1xf32> -> vector<1x8x1xf32>
    %217 = arith.mulf %215, %216 : vector<1x8x1xf32>
    %cst_100 = arith.constant 2.000000e+00 : f32
    %218 = vector.broadcast %cst_100 : f32 to vector<1x8x1xf32>
    %219 = arith.subf %218, %217 : vector<1x8x1xf32>
    %220 = arith.mulf %216, %219 : vector<1x8x1xf32>
    %221 = arith.mulf %215, %220 : vector<1x8x1xf32>
    %cst_101 = arith.constant 2.000000e+00 : f32
    %222 = vector.broadcast %cst_101 : f32 to vector<1x8x1xf32>
    %223 = arith.subf %222, %221 : vector<1x8x1xf32>
    %224 = arith.mulf %220, %223 : vector<1x8x1xf32>
    %225 = vector.broadcast %224 : vector<1x8x1xf32> to vector<1x8x8xf32>
    %226 = arith.mulf %213, %225 : vector<1x8x8xf32>
    "tpu.trace_start"() <{level = 10 : i32, message = "bqk,bkd->bqd"}> : () -> ()
    %cst_102 = arith.constant dense<0.000000e+00> : vector<1x8x8xf32>
    %227 = tpu.matmul %226, %207, %cst_102 {dimension_numbers = #tpu.dot_dimension_numbers<[2], [1], [1], [2], [0, 0, 0, 1, 1, 2], [0], [0]>} : vector<1x8x8xf32>, vector<1x8x8xf32>, vector<1x8x8xf32> -> vector<1x8x8xf32>
    "tpu.trace_stop"() : () -> ()
    %228 = vector.shape_cast %227 : vector<1x8x8xf32> to vector<8x8xf32>
    %c0_103 = arith.constant 0 : index
    %c0_104 = arith.constant 0 : index
    %c0_105 = arith.constant 0 : index
    %229 = vector.load %arg17[%c0_103, %c0_104, %c0_105] : memref<4x8x32xf32, #tpu.memory_space<vmem>>, vector<1x8x32xf32>
    %230 = vector.shape_cast %229 : vector<1x8x32xf32> to vector<8x32xf32>
    %cst_106 = arith.constant dense<0.000000e+00> : vector<8x32xf32>
    %231 = tpu.matmul %228, %230, %cst_106 {dimension_numbers = #tpu.dot_dimension_numbers<[1], [0], [0], [1], [0, 0, 1, 1], [], []>} : vector<8x8xf32>, vector<8x32xf32>, vector<8x32xf32> -> vector<8x32xf32>
    %232 = arith.addf %199, %231 : vector<8x32xf32>
    %233 = vector.extract_strided_slice %188 {offsets = [0, 8], sizes = [8, 8], strides = [1, 1]} : vector<8x32xf32> to vector<8x8xf32>
    %cst_107 = arith.constant 0.353553385 : f32
    %234 = vector.broadcast %cst_107 : f32 to vector<8x8xf32>
    %235 = arith.mulf %233, %234 : vector<8x8xf32>
    %236 = vector.shape_cast %235 : vector<8x8xf32> to vector<1x8x8xf32>
    %237 = vector.extract_strided_slice %193 {offsets = [0, 8], sizes = [8, 8], strides = [1, 1]} : vector<8x32xf32> to vector<8x8xf32>
    %238 = vector.shape_cast %237 : vector<8x8xf32> to vector<1x8x8xf32>
    %239 = vector.extract_strided_slice %198 {offsets = [0, 8], sizes = [8, 8], strides = [1, 1]} : vector<8x32xf32> to vector<8x8xf32>
    %240 = vector.shape_cast %239 : vector<8x8xf32> to vector<1x8x8xf32>
    "tpu.trace_start"() <{level = 10 : i32, message = "bqd,bkd->bqk"}> : () -> ()
    %cst_108 = arith.constant dense<0.000000e+00> : vector<1x8x8xf32>
    %241 = tpu.matmul %236, %238, %cst_108 {dimension_numbers = #tpu.dot_dimension_numbers<[2], [2], [1], [1], [0, 0, 0, 1, 1, 1], [0], [0]>} : vector<1x8x8xf32>, vector<1x8x8xf32>, vector<1x8x8xf32> -> vector<1x8x8xf32>
    "tpu.trace_stop"() : () -> ()
    %cst_109 = arith.constant dense<0xFF800000> : vector<1x8xf32>
    %242 = vector.multi_reduction <maximumf>, %241, %cst_109 [2] : vector<1x8x8xf32> to vector<1x8xf32>
    %243 = vector.shape_cast %242 : vector<1x8xf32> to vector<1x8x1xf32>
    %244 = vector.broadcast %243 : vector<1x8x1xf32> to vector<1x8x8xf32>
    %245 = arith.subf %241, %244 : vector<1x8x8xf32>
    %246 = math.exp %245 : vector<1x8x8xf32>
    %cst_110 = arith.constant dense<0.000000e+00> : vector<1x8xf32>
    %247 = vector.multi_reduction <add>, %246, %cst_110 [2] : vector<1x8x8xf32> to vector<1x8xf32>
    %248 = vector.shape_cast %247 : vector<1x8xf32> to vector<1x8x1xf32>
    %249 = tpu.reciprocal %248 {approx = true} : vector<1x8x1xf32> -> vector<1x8x1xf32>
    %250 = arith.mulf %248, %249 : vector<1x8x1xf32>
    %cst_111 = arith.constant 2.000000e+00 : f32
    %251 = vector.broadcast %cst_111 : f32 to vector<1x8x1xf32>
    %252 = arith.subf %251, %250 : vector<1x8x1xf32>
    %253 = arith.mulf %249, %252 : vector<1x8x1xf32>
    %254 = arith.mulf %248, %253 : vector<1x8x1xf32>
    %cst_112 = arith.constant 2.000000e+00 : f32
    %255 = vector.broadcast %cst_112 : f32 to vector<1x8x1xf32>
    %256 = arith.subf %255, %254 : vector<1x8x1xf32>
    %257 = arith.mulf %253, %256 : vector<1x8x1xf32>
    %258 = vector.broadcast %257 : vector<1x8x1xf32> to vector<1x8x8xf32>
    %259 = arith.mulf %246, %258 : vector<1x8x8xf32>
    "tpu.trace_start"() <{level = 10 : i32, message = "bqk,bkd->bqd"}> : () -> ()
    %cst_113 = arith.constant dense<0.000000e+00> : vector<1x8x8xf32>
    %260 = tpu.matmul %259, %240, %cst_113 {dimension_numbers = #tpu.dot_dimension_numbers<[2], [1], [1], [2], [0, 0, 0, 1, 1, 2], [0], [0]>} : vector<1x8x8xf32>, vector<1x8x8xf32>, vector<1x8x8xf32> -> vector<1x8x8xf32>
    "tpu.trace_stop"() : () -> ()
    %261 = vector.shape_cast %260 : vector<1x8x8xf32> to vector<8x8xf32>
    %c1_114 = arith.constant 1 : index
    %c0_115 = arith.constant 0 : index
    %c0_116 = arith.constant 0 : index
    %262 = vector.load %arg17[%c1_114, %c0_115, %c0_116] : memref<4x8x32xf32, #tpu.memory_space<vmem>>, vector<1x8x32xf32>
    %263 = vector.shape_cast %262 : vector<1x8x32xf32> to vector<8x32xf32>
    %cst_117 = arith.constant dense<0.000000e+00> : vector<8x32xf32>
    %264 = tpu.matmul %261, %263, %cst_117 {dimension_numbers = #tpu.dot_dimension_numbers<[1], [0], [0], [1], [0, 0, 1, 1], [], []>} : vector<8x8xf32>, vector<8x32xf32>, vector<8x32xf32> -> vector<8x32xf32>
    %265 = arith.addf %232, %264 : vector<8x32xf32>
    %266 = vector.extract_strided_slice %188 {offsets = [0, 16], sizes = [8, 8], strides = [1, 1]} : vector<8x32xf32> to vector<8x8xf32>
    %cst_118 = arith.constant 0.353553385 : f32
    %267 = vector.broadcast %cst_118 : f32 to vector<8x8xf32>
    %268 = arith.mulf %266, %267 : vector<8x8xf32>
    %269 = vector.shape_cast %268 : vector<8x8xf32> to vector<1x8x8xf32>
    %270 = vector.extract_strided_slice %193 {offsets = [0, 16], sizes = [8, 8], strides = [1, 1]} : vector<8x32xf32> to vector<8x8xf32>
    %271 = vector.shape_cast %270 : vector<8x8xf32> to vector<1x8x8xf32>
    %272 = vector.extract_strided_slice %198 {offsets = [0, 16], sizes = [8, 8], strides = [1, 1]} : vector<8x32xf32> to vector<8x8xf32>
    %273 = vector.shape_cast %272 : vector<8x8xf32> to vector<1x8x8xf32>
    "tpu.trace_start"() <{level = 10 : i32, message = "bqd,bkd->bqk"}> : () -> ()
    %cst_119 = arith.constant dense<0.000000e+00> : vector<1x8x8xf32>
    %274 = tpu.matmul %269, %271, %cst_119 {dimension_numbers = #tpu.dot_dimension_numbers<[2], [2], [1], [1], [0, 0, 0, 1, 1, 1], [0], [0]>} : vector<1x8x8xf32>, vector<1x8x8xf32>, vector<1x8x8xf32> -> vector<1x8x8xf32>
    "tpu.trace_stop"() : () -> ()
    %cst_120 = arith.constant dense<0xFF800000> : vector<1x8xf32>
    %275 = vector.multi_reduction <maximumf>, %274, %cst_120 [2] : vector<1x8x8xf32> to vector<1x8xf32>
    %276 = vector.shape_cast %275 : vector<1x8xf32> to vector<1x8x1xf32>
    %277 = vector.broadcast %276 : vector<1x8x1xf32> to vector<1x8x8xf32>
    %278 = arith.subf %274, %277 : vector<1x8x8xf32>
    %279 = math.exp %278 : vector<1x8x8xf32>
    %cst_121 = arith.constant dense<0.000000e+00> : vector<1x8xf32>
    %280 = vector.multi_reduction <add>, %279, %cst_121 [2] : vector<1x8x8xf32> to vector<1x8xf32>
    %281 = vector.shape_cast %280 : vector<1x8xf32> to vector<1x8x1xf32>
    %282 = tpu.reciprocal %281 {approx = true} : vector<1x8x1xf32> -> vector<1x8x1xf32>
    %283 = arith.mulf %281, %282 : vector<1x8x1xf32>
    %cst_122 = arith.constant 2.000000e+00 : f32
    %284 = vector.broadcast %cst_122 : f32 to vector<1x8x1xf32>
    %285 = arith.subf %284, %283 : vector<1x8x1xf32>
    %286 = arith.mulf %282, %285 : vector<1x8x1xf32>
    %287 = arith.mulf %281, %286 : vector<1x8x1xf32>
    %cst_123 = arith.constant 2.000000e+00 : f32
    %288 = vector.broadcast %cst_123 : f32 to vector<1x8x1xf32>
    %289 = arith.subf %288, %287 : vector<1x8x1xf32>
    %290 = arith.mulf %286, %289 : vector<1x8x1xf32>
    %291 = vector.broadcast %290 : vector<1x8x1xf32> to vector<1x8x8xf32>
    %292 = arith.mulf %279, %291 : vector<1x8x8xf32>
    "tpu.trace_start"() <{level = 10 : i32, message = "bqk,bkd->bqd"}> : () -> ()
    %cst_124 = arith.constant dense<0.000000e+00> : vector<1x8x8xf32>
    %293 = tpu.matmul %292, %273, %cst_124 {dimension_numbers = #tpu.dot_dimension_numbers<[2], [1], [1], [2], [0, 0, 0, 1, 1, 2], [0], [0]>} : vector<1x8x8xf32>, vector<1x8x8xf32>, vector<1x8x8xf32> -> vector<1x8x8xf32>
    "tpu.trace_stop"() : () -> ()
    %294 = vector.shape_cast %293 : vector<1x8x8xf32> to vector<8x8xf32>
    %c2_125 = arith.constant 2 : index
    %c0_126 = arith.constant 0 : index
    %c0_127 = arith.constant 0 : index
    %295 = vector.load %arg17[%c2_125, %c0_126, %c0_127] : memref<4x8x32xf32, #tpu.memory_space<vmem>>, vector<1x8x32xf32>
    %296 = vector.shape_cast %295 : vector<1x8x32xf32> to vector<8x32xf32>
    %cst_128 = arith.constant dense<0.000000e+00> : vector<8x32xf32>
    %297 = tpu.matmul %294, %296, %cst_128 {dimension_numbers = #tpu.dot_dimension_numbers<[1], [0], [0], [1], [0, 0, 1, 1], [], []>} : vector<8x8xf32>, vector<8x32xf32>, vector<8x32xf32> -> vector<8x32xf32>
    %298 = arith.addf %265, %297 : vector<8x32xf32>
    %299 = vector.extract_strided_slice %188 {offsets = [0, 24], sizes = [8, 8], strides = [1, 1]} : vector<8x32xf32> to vector<8x8xf32>
    %cst_129 = arith.constant 0.353553385 : f32
    %300 = vector.broadcast %cst_129 : f32 to vector<8x8xf32>
    %301 = arith.mulf %299, %300 : vector<8x8xf32>
    %302 = vector.shape_cast %301 : vector<8x8xf32> to vector<1x8x8xf32>
    %303 = vector.extract_strided_slice %193 {offsets = [0, 24], sizes = [8, 8], strides = [1, 1]} : vector<8x32xf32> to vector<8x8xf32>
    %304 = vector.shape_cast %303 : vector<8x8xf32> to vector<1x8x8xf32>
    %305 = vector.extract_strided_slice %198 {offsets = [0, 24], sizes = [8, 8], strides = [1, 1]} : vector<8x32xf32> to vector<8x8xf32>
    %306 = vector.shape_cast %305 : vector<8x8xf32> to vector<1x8x8xf32>
    "tpu.trace_start"() <{level = 10 : i32, message = "bqd,bkd->bqk"}> : () -> ()
    %cst_130 = arith.constant dense<0.000000e+00> : vector<1x8x8xf32>
    %307 = tpu.matmul %302, %304, %cst_130 {dimension_numbers = #tpu.dot_dimension_numbers<[2], [2], [1], [1], [0, 0, 0, 1, 1, 1], [0], [0]>} : vector<1x8x8xf32>, vector<1x8x8xf32>, vector<1x8x8xf32> -> vector<1x8x8xf32>
    "tpu.trace_stop"() : () -> ()
    %cst_131 = arith.constant dense<0xFF800000> : vector<1x8xf32>
    %308 = vector.multi_reduction <maximumf>, %307, %cst_131 [2] : vector<1x8x8xf32> to vector<1x8xf32>
    %309 = vector.shape_cast %308 : vector<1x8xf32> to vector<1x8x1xf32>
    %310 = vector.broadcast %309 : vector<1x8x1xf32> to vector<1x8x8xf32>
    %311 = arith.subf %307, %310 : vector<1x8x8xf32>
    %312 = math.exp %311 : vector<1x8x8xf32>
    %cst_132 = arith.constant dense<0.000000e+00> : vector<1x8xf32>
    %313 = vector.multi_reduction <add>, %312, %cst_132 [2] : vector<1x8x8xf32> to vector<1x8xf32>
    %314 = vector.shape_cast %313 : vector<1x8xf32> to vector<1x8x1xf32>
    %315 = tpu.reciprocal %314 {approx = true} : vector<1x8x1xf32> -> vector<1x8x1xf32>
    %316 = arith.mulf %314, %315 : vector<1x8x1xf32>
    %cst_133 = arith.constant 2.000000e+00 : f32
    %317 = vector.broadcast %cst_133 : f32 to vector<1x8x1xf32>
    %318 = arith.subf %317, %316 : vector<1x8x1xf32>
    %319 = arith.mulf %315, %318 : vector<1x8x1xf32>
    %320 = arith.mulf %314, %319 : vector<1x8x1xf32>
    %cst_134 = arith.constant 2.000000e+00 : f32
    %321 = vector.broadcast %cst_134 : f32 to vector<1x8x1xf32>
    %322 = arith.subf %321, %320 : vector<1x8x1xf32>
    %323 = arith.mulf %319, %322 : vector<1x8x1xf32>
    %324 = vector.broadcast %323 : vector<1x8x1xf32> to vector<1x8x8xf32>
    %325 = arith.mulf %312, %324 : vector<1x8x8xf32>
    "tpu.trace_start"() <{level = 10 : i32, message = "bqk,bkd->bqd"}> : () -> ()
    %cst_135 = arith.constant dense<0.000000e+00> : vector<1x8x8xf32>
    %326 = tpu.matmul %325, %306, %cst_135 {dimension_numbers = #tpu.dot_dimension_numbers<[2], [1], [1], [2], [0, 0, 0, 1, 1, 2], [0], [0]>} : vector<1x8x8xf32>, vector<1x8x8xf32>, vector<1x8x8xf32> -> vector<1x8x8xf32>
    "tpu.trace_stop"() : () -> ()
    %327 = vector.shape_cast %326 : vector<1x8x8xf32> to vector<8x8xf32>
    %c3_136 = arith.constant 3 : index
    %c0_137 = arith.constant 0 : index
    %c0_138 = arith.constant 0 : index
    %328 = vector.load %arg17[%c3_136, %c0_137, %c0_138] : memref<4x8x32xf32, #tpu.memory_space<vmem>>, vector<1x8x32xf32>
    %329 = vector.shape_cast %328 : vector<1x8x32xf32> to vector<8x32xf32>
    %cst_139 = arith.constant dense<0.000000e+00> : vector<8x32xf32>
    %330 = tpu.matmul %327, %329, %cst_139 {dimension_numbers = #tpu.dot_dimension_numbers<[1], [0], [0], [1], [0, 0, 1, 1], [], []>} : vector<8x8xf32>, vector<8x32xf32>, vector<8x32xf32> -> vector<8x32xf32>
    %331 = arith.addf %298, %330 : vector<8x32xf32>
    %c0_140 = arith.constant 0 : index
    %c0_141 = arith.constant 0 : index
    %332 = vector.load %arg18[%c0_140, %c0_141] : memref<1x32xf32, #tpu.memory_space<vmem>>, vector<1x32xf32>
    %333 = vector.broadcast %332 : vector<1x32xf32> to vector<8x32xf32>
    %334 = arith.addf %331, %333 : vector<8x32xf32>
    %335 = arith.addf %183, %334 : vector<8x32xf32>
    %cst_142 = arith.constant dense<0.000000e+00> : vector<8xf32>
    %336 = vector.multi_reduction <add>, %335, %cst_142 [1] : vector<8x32xf32> to vector<8xf32>
    %337 = vector.shape_cast %336 : vector<8xf32> to vector<8x1xf32>
    %cst_143 = arith.constant 3.200000e+01 : f32
    %338 = vector.broadcast %cst_143 : f32 to vector<8x1xf32>
    %339 = arith.divf %337, %338 : vector<8x1xf32>
    %340 = vector.broadcast %339 : vector<8x1xf32> to vector<8x32xf32>
    %341 = arith.subf %335, %340 : vector<8x32xf32>
    %342 = arith.mulf %341, %341 : vector<8x32xf32>
    %cst_144 = arith.constant dense<0.000000e+00> : vector<8xf32>
    %343 = vector.multi_reduction <add>, %342, %cst_144 [1] : vector<8x32xf32> to vector<8xf32>
    %344 = vector.shape_cast %343 : vector<8xf32> to vector<8x1xf32>
    %cst_145 = arith.constant 3.200000e+01 : f32
    %345 = vector.broadcast %cst_145 : f32 to vector<8x1xf32>
    %346 = arith.divf %344, %345 : vector<8x1xf32>
    %347 = vector.broadcast %339 : vector<8x1xf32> to vector<8x32xf32>
    %348 = arith.subf %335, %347 : vector<8x32xf32>
    %cst_146 = arith.constant 9.99999974E-6 : f32
    %349 = vector.broadcast %cst_146 : f32 to vector<8x1xf32>
    %350 = arith.addf %346, %349 : vector<8x1xf32>
    %351 = math.rsqrt %350 : vector<8x1xf32>
    %352 = vector.broadcast %351 : vector<8x1xf32> to vector<8x32xf32>
    %353 = arith.mulf %348, %352 : vector<8x32xf32>
    %354 = vector.broadcast %2 : vector<1x32xf32> to vector<8x32xf32>
    %355 = arith.mulf %353, %354 : vector<8x32xf32>
    %356 = vector.broadcast %3 : vector<1x32xf32> to vector<8x32xf32>
    %357 = arith.addf %355, %356 : vector<8x32xf32>
    %c0_147 = arith.constant 0 : index
    %c0_148 = arith.constant 0 : index
    %358 = vector.load %arg25[%c0_147, %c0_148] : memref<32x64xf32, #tpu.memory_space<vmem>>, vector<32x64xf32>
    %cst_149 = arith.constant dense<0.000000e+00> : vector<8x64xf32>
    %359 = tpu.matmul %357, %358, %cst_149 {dimension_numbers = #tpu.dot_dimension_numbers<[1], [0], [0], [1], [0, 0, 1, 1], [], []>} : vector<8x32xf32>, vector<32x64xf32>, vector<8x64xf32> -> vector<8x64xf32>
    %c0_150 = arith.constant 0 : index
    %c0_151 = arith.constant 0 : index
    %360 = vector.load %arg26[%c0_150, %c0_151] : memref<1x64xf32, #tpu.memory_space<vmem>>, vector<1x64xf32>
    %361 = vector.broadcast %360 : vector<1x64xf32> to vector<8x64xf32>
    %362 = arith.addf %359, %361 : vector<8x64xf32>
    %cst_152 = arith.constant 0.000000e+00 : f32
    %363 = vector.broadcast %cst_152 : f32 to vector<8x64xf32>
    %364 = arith.maximumf %362, %363 : vector<8x64xf32>
    %c0_153 = arith.constant 0 : index
    %c0_154 = arith.constant 0 : index
    %365 = vector.load %arg27[%c0_153, %c0_154] : memref<64x32xf32, #tpu.memory_space<vmem>>, vector<64x32xf32>
    %cst_155 = arith.constant dense<0.000000e+00> : vector<8x32xf32>
    %366 = tpu.matmul %364, %365, %cst_155 {dimension_numbers = #tpu.dot_dimension_numbers<[1], [0], [0], [1], [0, 0, 1, 1], [], []>} : vector<8x64xf32>, vector<64x32xf32>, vector<8x32xf32> -> vector<8x32xf32>
    %c0_156 = arith.constant 0 : index
    %c0_157 = arith.constant 0 : index
    %367 = vector.load %arg28[%c0_156, %c0_157] : memref<1x32xf32, #tpu.memory_space<vmem>>, vector<1x32xf32>
    %368 = vector.broadcast %367 : vector<1x32xf32> to vector<8x32xf32>
    %369 = arith.addf %366, %368 : vector<8x32xf32>
    %370 = arith.addf %357, %369 : vector<8x32xf32>
    %cst_158 = arith.constant dense<0.000000e+00> : vector<8xf32>
    %371 = vector.multi_reduction <add>, %370, %cst_158 [1] : vector<8x32xf32> to vector<8xf32>
    %372 = vector.shape_cast %371 : vector<8xf32> to vector<8x1xf32>
    %cst_159 = arith.constant 3.200000e+01 : f32
    %373 = vector.broadcast %cst_159 : f32 to vector<8x1xf32>
    %374 = arith.divf %372, %373 : vector<8x1xf32>
    %375 = vector.broadcast %374 : vector<8x1xf32> to vector<8x32xf32>
    %376 = arith.subf %370, %375 : vector<8x32xf32>
    %377 = arith.mulf %376, %376 : vector<8x32xf32>
    %cst_160 = arith.constant dense<0.000000e+00> : vector<8xf32>
    %378 = vector.multi_reduction <add>, %377, %cst_160 [1] : vector<8x32xf32> to vector<8xf32>
    %379 = vector.shape_cast %378 : vector<8xf32> to vector<8x1xf32>
    %cst_161 = arith.constant 3.200000e+01 : f32
    %380 = vector.broadcast %cst_161 : f32 to vector<8x1xf32>
    %381 = arith.divf %379, %380 : vector<8x1xf32>
    %382 = vector.broadcast %374 : vector<8x1xf32> to vector<8x32xf32>
    %383 = arith.subf %370, %382 : vector<8x32xf32>
    %cst_162 = arith.constant 9.99999974E-6 : f32
    %384 = vector.broadcast %cst_162 : f32 to vector<8x1xf32>
    %385 = arith.addf %381, %384 : vector<8x1xf32>
    %386 = math.rsqrt %385 : vector<8x1xf32>
    %387 = vector.broadcast %386 : vector<8x1xf32> to vector<8x32xf32>
    %388 = arith.mulf %383, %387 : vector<8x32xf32>
    %389 = vector.broadcast %4 : vector<1x32xf32> to vector<8x32xf32>
    %390 = arith.mulf %388, %389 : vector<8x32xf32>
    %391 = vector.broadcast %5 : vector<1x32xf32> to vector<8x32xf32>
    %392 = arith.addf %390, %391 : vector<8x32xf32>
    %393 = vector.shape_cast %392 : vector<8x32xf32> to vector<1x8x32xf32>
    %c0_163 = arith.constant 0 : index
    %c0_164 = arith.constant 0 : index
    %c0_165 = arith.constant 0 : index
    %394 = vector.load %arg31[%c0_163, %c0_164, %c0_165] : memref<1x8x32xf32, #tpu.memory_space<vmem>>, vector<1x8x32xf32>
    tpu.vector_store %arg31[%c0_163, %c0_164, %c0_165], %393 {strides = array<i32>} : memref<1x8x32xf32, #tpu.memory_space<vmem>>, vector<1x8x32xf32>,
    %c0_166 = arith.constant 0 : index
    %c0_167 = arith.constant 0 : index
    %395 = vector.load %arg29[%c0_166, %c0_167] : memref<32x128xf32, #tpu.memory_space<vmem>>, vector<32x128xf32>
    %cst_168 = arith.constant dense<0.000000e+00> : vector<8x128xf32>
    %396 = tpu.matmul %392, %395, %cst_168 {dimension_numbers = #tpu.dot_dimension_numbers<[1], [0], [0], [1], [0, 0, 1, 1], [], []>} : vector<8x32xf32>, vector<32x128xf32>, vector<8x128xf32> -> vector<8x128xf32>
    %c0_169 = arith.constant 0 : index
    %c0_170 = arith.constant 0 : index
    %397 = vector.load %arg30[%c0_169, %c0_170] : memref<1x128xf32, #tpu.memory_space<vmem>>, vector<1x128xf32>
    %398 = vector.broadcast %397 : vector<1x128xf32> to vector<8x128xf32>
    %399 = arith.addf %396, %398 : vector<8x128xf32>
    %400 = vector.shape_cast %399 : vector<8x128xf32> to vector<1x8x128xf32>
    %c0_171 = arith.constant 0 : index
    %c0_172 = arith.constant 0 : index
    %c0_173 = arith.constant 0 : index
    %401 = vector.load %arg32[%c0_171, %c0_172, %c0_173] : memref<1x8x128xf32, #tpu.memory_space<vmem>>, vector<1x8x128xf32>
    tpu.vector_store %arg32[%c0_171, %c0_172, %c0_173], %400 {strides = array<i32>} : memref<1x8x128xf32, #tpu.memory_space<vmem>>, vector<1x8x128xf32>,
    return
  }
  func.func @transform_0(%arg0: i32) -> (i32, i32, i32) {
    %c0_i32 = arith.constant 0 : i32
    %c0_i32_0 = arith.constant 0 : i32
    %c0_i32_1 = arith.constant 0 : i32
    return %arg0, %c0_i32, %c0_i32_0 : i32, i32, i32
  }
  func.func @transform_1(%arg0: i32) -> (i32, i32, i32) {
    %c0_i32 = arith.constant 0 : i32
    %c0_i32_0 = arith.constant 0 : i32
    %c0_i32_1 = arith.constant 0 : i32
    return %arg0, %c0_i32, %c0_i32_0 : i32, i32, i32
  }
  func.func @transform_2(%arg0: i32) -> (i32, i32) {
    %c0_i32 = arith.constant 0 : i32
    %c0_i32_0 = arith.constant 0 : i32
    %c0_i32_1 = arith.constant 0 : i32
    return %c0_i32, %c0_i32_0 : i32, i32
  }
  func.func @transform_3(%arg0: i32) -> (i32, i32) {
    %c0_i32 = arith.constant 0 : i32
    %c0_i32_0 = arith.constant 0 : i32
    %c0_i32_1 = arith.constant 0 : i32
    return %c0_i32, %c0_i32_0 : i32, i32
  }
  func.func @transform_4(%arg0: i32) -> (i32, i32) {
    %c0_i32 = arith.constant 0 : i32
    %c0_i32_0 = arith.constant 0 : i32
    %c0_i32_1 = arith.constant 0 : i32
    return %c0_i32, %c0_i32_0 : i32, i32
  }
  func.func @transform_5(%arg0: i32) -> (i32, i32) {
    %c0_i32 = arith.constant 0 : i32
    %c0_i32_0 = arith.constant 0 : i32
    %c0_i32_1 = arith.constant 0 : i32
    return %c0_i32, %c0_i32_0 : i32, i32
  }
  func.func @transform_6(%arg0: i32) -> (i32, i32) {
    %c0_i32 = arith.constant 0 : i32
    %c0_i32_0 = arith.constant 0 : i32
    %c0_i32_1 = arith.constant 0 : i32
    return %c0_i32, %c0_i32_0 : i32, i32
  }
  func.func @transform_7(%arg0: i32) -> (i32, i32) {
    %c0_i32 = arith.constant 0 : i32
    %c0_i32_0 = arith.constant 0 : i32
    %c0_i32_1 = arith.constant 0 : i32
    return %c0_i32, %c0_i32_0 : i32, i32
  }
  func.func @transform_8(%arg0: i32) -> (i32, i32, i32) {
    %c0_i32 = arith.constant 0 : i32
    %c0_i32_0 = arith.constant 0 : i32
    %c0_i32_1 = arith.constant 0 : i32
    %c0_i32_2 = arith.constant 0 : i32
    return %c0_i32, %c0_i32_0, %c0_i32_1 : i32, i32, i32
  }
  func.func @transform_9(%arg0: i32) -> (i32, i32) {
    %c0_i32 = arith.constant 0 : i32
    %c0_i32_0 = arith.constant 0 : i32
    %c0_i32_1 = arith.constant 0 : i32
    return %c0_i32, %c0_i32_0 : i32, i32
  }
  func.func @transform_10(%arg0: i32) -> (i32, i32) {
    %c0_i32 = arith.constant 0 : i32
    %c0_i32_0 = arith.constant 0 : i32
    %c0_i32_1 = arith.constant 0 : i32
    return %c0_i32, %c0_i32_0 : i32, i32
  }
  func.func @transform_11(%arg0: i32) -> (i32, i32) {
    %c0_i32 = arith.constant 0 : i32
    %c0_i32_0 = arith.constant 0 : i32
    %c0_i32_1 = arith.constant 0 : i32
    return %c0_i32, %c0_i32_0 : i32, i32
  }
  func.func @transform_12(%arg0: i32) -> (i32, i32) {
    %c0_i32 = arith.constant 0 : i32
    %c0_i32_0 = arith.constant 0 : i32
    %c0_i32_1 = arith.constant 0 : i32
    return %c0_i32, %c0_i32_0 : i32, i32
  }
  func.func @transform_13(%arg0: i32) -> (i32, i32) {
    %c0_i32 = arith.constant 0 : i32
    %c0_i32_0 = arith.constant 0 : i32
    %c0_i32_1 = arith.constant 0 : i32
    return %c0_i32, %c0_i32_0 : i32, i32
  }
  func.func @transform_14(%arg0: i32) -> (i32, i32) {
    %c0_i32 = arith.constant 0 : i32
    %c0_i32_0 = arith.constant 0 : i32
    %c0_i32_1 = arith.constant 0 : i32
    return %c0_i32, %c0_i32_0 : i32, i32
  }
  func.func @transform_15(%arg0: i32) -> (i32, i32) {
    %c0_i32 = arith.constant 0 : i32
    %c0_i32_0 = arith.constant 0 : i32
    %c0_i32_1 = arith.constant 0 : i32
    return %c0_i32, %c0_i32_0 : i32, i32
  }
  func.func @transform_16(%arg0: i32) -> (i32, i32, i32) {
    %c0_i32 = arith.constant 0 : i32
    %c0_i32_0 = arith.constant 0 : i32
    %c0_i32_1 = arith.constant 0 : i32
    %c0_i32_2 = arith.constant 0 : i32
    return %c0_i32, %c0_i32_0, %c0_i32_1 : i32, i32, i32
  }
  func.func @transform_17(%arg0: i32) -> (i32, i32) {
    %c0_i32 = arith.constant 0 : i32
    %c0_i32_0 = arith.constant 0 : i32
    %c0_i32_1 = arith.constant 0 : i32
    return %c0_i32, %c0_i32_0 : i32, i32
  }
  func.func @transform_18(%arg0: i32) -> (i32, i32) {
    %c0_i32 = arith.constant 0 : i32
    %c0_i32_0 = arith.constant 0 : i32
    %c0_i32_1 = arith.constant 0 : i32
    return %c0_i32, %c0_i32_0 : i32, i32
  }
  func.func @transform_19(%arg0: i32) -> (i32, i32) {
    %c0_i32 = arith.constant 0 : i32
    %c0_i32_0 = arith.constant 0 : i32
    %c0_i32_1 = arith.constant 0 : i32
    return %c0_i32, %c0_i32_0 : i32, i32
  }
  func.func @transform_20(%arg0: i32) -> (i32, i32) {
    %c0_i32 = arith.constant 0 : i32
    %c0_i32_0 = arith.constant 0 : i32
    %c0_i32_1 = arith.constant 0 : i32
    return %c0_i32, %c0_i32_0 : i32, i32
  }
  func.func @transform_21(%arg0: i32) -> (i32, i32) {
    %c0_i32 = arith.constant 0 : i32
    %c0_i32_0 = arith.constant 0 : i32
    %c0_i32_1 = arith.constant 0 : i32
    return %c0_i32, %c0_i32_0 : i32, i32
  }
  func.func @transform_22(%arg0: i32) -> (i32, i32) {
    %c0_i32 = arith.constant 0 : i32
    %c0_i32_0 = arith.constant 0 : i32
    %c0_i32_1 = arith.constant 0 : i32
    return %c0_i32, %c0_i32_0 : i32, i32
  }
  func.func @transform_23(%arg0: i32) -> (i32, i32) {
    %c0_i32 = arith.constant 0 : i32
    %c0_i32_0 = arith.constant 0 : i32
    %c0_i32_1 = arith.constant 0 : i32
    return %c0_i32, %c0_i32_0 : i32, i32
  }
  func.func @transform_24(%arg0: i32) -> (i32, i32) {
    %c0_i32 = arith.constant 0 : i32
    %c0_i32_0 = arith.constant 0 : i32
    %c0_i32_1 = arith.constant 0 : i32
    return %c0_i32, %c0_i32_0 : i32, i32
  }
  func.func @transform_25(%arg0: i32) -> (i32, i32) {
    %c0_i32 = arith.constant 0 : i32
    %c0_i32_0 = arith.constant 0 : i32
    %c0_i32_1 = arith.constant 0 : i32
    return %c0_i32, %c0_i32_0 : i32, i32
  }
  func.func @transform_26(%arg0: i32) -> (i32, i32) {
    %c0_i32 = arith.constant 0 : i32
    %c0_i32_0 = arith.constant 0 : i32
    %c0_i32_1 = arith.constant 0 : i32
    return %c0_i32, %c0_i32_0 : i32, i32
  }
  func.func @transform_27(%arg0: i32) -> (i32, i32) {
    %c0_i32 = arith.constant 0 : i32
    %c0_i32_0 = arith.constant 0 : i32
    %c0_i32_1 = arith.constant 0 : i32
    return %c0_i32, %c0_i32_0 : i32, i32
  }
  func.func @transform_28(%arg0: i32) -> (i32, i32) {
    %c0_i32 = arith.constant 0 : i32
    %c0_i32_0 = arith.constant 0 : i32
    %c0_i32_1 = arith.constant 0 : i32
    return %c0_i32, %c0_i32_0 : i32, i32
  }
  func.func @transform_29(%arg0: i32) -> (i32, i32) {
    %c0_i32 = arith.constant 0 : i32
    %c0_i32_0 = arith.constant 0 : i32
    %c0_i32_1 = arith.constant 0 : i32
    return %c0_i32, %c0_i32_0 : i32, i32
  }
  func.func @transform_30(%arg0: i32) -> (i32, i32, i32) {
    %c0_i32 = arith.constant 0 : i32
    %c0_i32_0 = arith.constant 0 : i32
    %c0_i32_1 = arith.constant 0 : i32
    return %arg0, %c0_i32, %c0_i32_0 : i32, i32, i32
  }
  func.func @transform_31(%arg0: i32) -> (i32, i32, i32) {
    %c0_i32 = arith.constant 0 : i32
    %c0_i32_0 = arith.constant 0 : i32
    %c0_i32_1 = arith.constant 0 : i32
    return %arg0, %c0_i32, %c0_i32_0 : i32, i32, i32
  }
}

</mosaic_0001>

<bundles_post_ra>
// kernel: tpu_custom_call.1
= control target key start
LH: loop header
LB: loop body
LE: loop exit
PB: predicated region body
PF: predicated region fallthrough
CT: control target
= control target key end

     0   :  { %s3245_s6 = smov 1   ;;  %s3246_s10 = smov 2   ;;  %s3891_s0 = inlined_call_operand.smem [shape: u32[32], index: -1, kind: input, shape index: {}] }
   0x1   :  { %s3297_s5 = sld [smem:[%s3891_s0]]   ;;  %s3247_s14 = smov 3  }
   0x2   :  { %s3302_s9 = sld [smem:[%s3891_s0 + %s3245_s6]]   ;;  %s3248_s18 = smov 4  }
   0x3   :  { %s3307_s13 = sld [smem:[%s3891_s0 + %s3246_s10]]   ;;  %s3249_s22 = smov 5  }
   0x4   :  { %s3312_s17 = sld [smem:[%s3891_s0 + %s3247_s14]]   ;;  %s3250_s26 = smov 6  }
   0x5   :  { %s3317_s21 = sld [smem:[%s3891_s0 + %s3248_s18]]   ;;  %s3251_s30 = smov 7  }
   0x6   :  { %s3322_s25 = sld [smem:[%s3891_s0 + %s3249_s22]]   ;;  %s3252_s4 = smov 8  }
   0x7   :  { %s3327_s29 = sld [smem:[%s3891_s0 + %s3250_s26]]   ;;  %s3253_s10 = smov 9  }
   0x8   :  { %s3332_s3 = sld [smem:[%s3891_s0 + %s3251_s30]]   ;;  %s3254_s15 = smov 10  }
   0x9   :  { %s3337_s8 = sld [smem:[%s3891_s0 + %s3252_s4]]   ;;  %s3255_s20 = smov 11  }
   0xa   :  { %s3342_s14 = sld [smem:[%s3891_s0 + %s3253_s10]]   ;;  %s3256_s26 = smov 12  }
   0xb   :  { %3904 = sst [smem:[#allocation28_spill]] %s3317_s21  ;;  %s3257_s1 = smov 13  }
   0xc   :  { %s3347_s19 = sld [smem:[%s3891_s0 + %s3254_s15]]   ;;  %s3258_s7 = smov 14  }
   0xd   :  { %s3352_s24 = sld [smem:[%s3891_s0 + %s3255_s20]]   ;;  %s3259_s15 = smov 15  }
   0xe   :  { %3905 = sst [smem:[#allocation29_spill]] %s3332_s3  ;;  %s3260_s22 = smov 16  }
   0xf   :  { %3906 = sst [smem:[#allocation30_spill]] %s3337_s8  ;;  %s3261_s28 = smov 17  }
  0x10   :  { %3907 = sst [smem:[#allocation31_spill]] %s3342_s14 }
  0x11   :  { %s3357_s30 = sld [smem:[%s3891_s0 + %s3256_s26]]  }
  0x12   :  { %3908 = sst [smem:[#allocation32_spill]] %s3347_s19 }
  0x13   :  { %3909 = sst [smem:[#allocation33_spill]] %s3352_s24 }
  0x14   :  { %s3362_s6 = sld [smem:[%s3891_s0 + %s3257_s1]]  }
  0x15   :  { %s3367_s12 = sld [smem:[%s3891_s0 + %s3258_s7]]   ;;  %s3262_s7 = smov 18  }
  0x16   :  { %s3372_s20 = sld [smem:[%s3891_s0 + %s3259_s15]]   ;;  %s3263_s15 = smov 19  }
  0x17   :  { %3910 = sst [smem:[#allocation34_spill]] %s3357_s30 }
  0x18   :  { %s3377_s27 = sld [smem:[%s3891_s0 + %s3260_s22]]   ;;  %s3264_s22 = smov 20  }
  0x19   :  { %s3382_s4 = sld [smem:[%s3891_s0 + %s3261_s28]]   ;;  %s3265_s28 = smov 21  }
  0x1a   :  { %3911 = sst [smem:[#allocation35_spill]] %s3362_s6 }
  0x1b   :  { %3912 = sst [smem:[#allocation36_spill]] %s3367_s12 }
  0x1c   :  { %3913 = sst [smem:[#allocation37_spill]] %s3372_s20 }
  0x1d   :  { %s3387_s6 = sld [smem:[%s3891_s0 + %s3262_s7]]   ;;  %s3266_s7 = smov 22  }
  0x1e   :  { %3914 = sst [smem:[#allocation38_spill]] %s3377_s27 }
  0x1f   :  { %3915 = sst [smem:[#allocation39_spill]] %s3382_s4 }
  0x20   :  { %s3392_s20 = sld [smem:[%s3891_s0 + %s3263_s15]]   ;;  %s3267_s15 = smov 23  }
  0x21   :  { %s3397_s12 = sld [smem:[%s3891_s0 + %s3264_s22]]   ;;  %s3268_s22 = smov 24  }
  0x22   :  { %s3402_s4 = sld [smem:[%s3891_s0 + %s3265_s28]]   ;;  %s3269_s28 = smov 25  }
  0x23   :  { %3916 = sst [smem:[#allocation40_spill]] %s3387_s6 }
  0x24   :  { %s3407_s6 = sld [smem:[%s3891_s0 + %s3266_s7]]   ;;  %s3270_s7 = smov 26  }
  0x26   :  { %3917 = sst [smem:[#allocation41_spill]] %s3392_s20 }
  0x27   :  { %3918 = sst [smem:[#allocation42_spill]] %s3397_s12 }
  0x28   :  { %3919 = sst [smem:[#allocation43_spill]] %s3402_s4 }
  0x29   :  { %s3412_s20 = sld [smem:[%s3891_s0 + %s3267_s15]]   ;;  %s3271_s15 = smov 27  }
  0x2a   :  { %3920 = sst [smem:[#allocation44_spill]] %s3407_s6 }
  0x2b   :  { %s3417_s12 = sld [smem:[%s3891_s0 + %s3268_s22]]   ;;  %s3272_s22 = smov 28  }
  0x2c   :  { %s3422_s4 = sld [smem:[%s3891_s0 + %s3269_s28]]   ;;  %s3273_s28 = smov 29  }
  0x2d   :  { %s3427_s6 = sld [smem:[%s3891_s0 + %s3270_s7]]   ;;  %s3274_s7 = smov 30  }
  0x2e   :  { %s3437_s14 = sld [smem:[%s3891_s0 + %s3272_s22]]  }
  0x2f   :  { %3921 = sst [smem:[#allocation45_spill]] %s3412_s20 }
  0x30   :  { %s3432_s20 = sld [smem:[%s3891_s0 + %s3271_s15]]   ;;  %s3275_s15 = smov 31  }
  0x31   :  { %3922 = sst [smem:[#allocation46_spill]] %s3417_s12 }
  0x32   :  { %3923 = sst [smem:[#allocation47_spill]] %s3422_s4 }
  0x33   :  { %3924 = sst [smem:[#allocation48_spill]] %s3427_s6 }
  0x34   :  { %3926 = sst [smem:[#allocation50_spill]] %s3437_s14 }
  0x35   :  { %s3442_s4 = sld [smem:[%s3891_s0 + %s3273_s28]]  }
  0x36   :  { %3925 = sst [smem:[#allocation49_spill]] %s3432_s20 }
  0x37   :  { %s3447_s6 = sld [smem:[%s3891_s0 + %s3274_s7]]  }
  0x38   :  { %s3452_s20 = sld [smem:[%s3891_s0 + %s3275_s15]]  }
  0x3b   :  { %3927 = sst [smem:[#allocation51_spill]] %s3442_s4 }
  0x3d   :  { %3928 = sst [smem:[#allocation52_spill]] %s3447_s6 }
  0x3e   :  { %3929 = sst [smem:[#allocation53_spill]] %s3452_s20 }
  0x3f   :  { %69 = vsyncpa [#allocation3], 0 }
  0x40   :  { %71 = vsyncpa [#allocation3 + $0x1], 0 }
  0x41   :  { %72 = vsyncpa [#allocation6], 0 }
  0x42   :  { %74 = vsyncpa [#allocation6 + $0x1], 0 }
  0x43   :  { %75 = vsyncpa [#allocation9], 0 }
  0x44   :  { %76 = vsyncpa [#allocation12], 0 }
  0x45   :  { %77 = vsyncpa [#allocation15], 0 }
  0x46   :  { %78 = vsyncpa [#allocation4], 0 }
  0x47   :  { %80 = vsyncpa [#allocation4 + $0x1], 0 }
  0x48   :  { %81 = vsyncpa [#allocation19], 0 }
  0x49   :  { %83 = vsyncpa [#allocation19 + $0x1], 0  ;;  %s3454_s22 = smov 0   ;;  %s3456_s23 = smov 0  }
  0x4a   :  { %s3458_s26 = smov 0   ;;  %s3460_s28 = smov 0  }
  0x4b LB: > { %s3930_s30 = sld [smem:[#allocation34_spill]]  ;;  %s3478_s1 = sadd.s32 4294967295, %s3243_s28   ;;  %s3239_s26 = sphi %s3458_s26, %s3968_s26   ;;  %s3235_s23 = sphi %s3456_s23, %s3970_s23   ;;  %s3231_s22 = sphi %s3454_s22, %s3969_s22   ;;  %s3243_s28 = sphi %s3460_s28, %s3971_s28  }
  0x4c   : > { %s3931_s27 = sld [smem:[#allocation38_spill]]  ;;  %p2562_p0 = scmp.ge.s32.totalorder %s3243_s28, 1 }
  0x4d   : > { %s3932_s24 = sld [smem:[#allocation33_spill]]  ;;  %p110_p1 = scmp.eq.s32.totalorder %s3478_s1, 0 }
  0x4e   : > { %s3933_s19 = sld [smem:[#allocation32_spill]]  ;;  %p786_p2 = scmp.lt.s32.totalorder %s3243_s28, 3 }
  0x4f   : > { %s3934_s14 = sld [smem:[#allocation50_spill]]  ;;  %s3276_s7 = smov [#allocation7]  }
  0x50   : > { %s3935_s12 = sld [smem:[#allocation46_spill]]  ;;  %p3483_p3 = pnand %p2562_p0, %p786_p2 }
  0x51   : > { %s3936_s8 = sld [smem:[#allocation30_spill]]  ;;  %s3487_s10 = sshll.u32 %s3276_s7, 4  ;;  %s818_s10 = int_to_ptr.vmem [resolvable:$true] %s3487_s10 }
  0x52   : > { %3937 = sst [smem:[#allocation54_spill]] %s3239_s26  ;;  %p2670_p4 = pneg %p3483_p3 }
  0x53   : > { %s860_s16 = sshll.u32 %s3930_s30, 4  ;;  %s3277_s18 = smov [#allocation8]   ;;  %s3523_s16 = int_to_ptr.hbm [resolvable:$true] %s860_s16 }
  0x54   : > { %s832_s11 = sshll.u32 %s3933_s19, 4  ;;  %p3496_p6 = pnand %p2670_p4, %p110_p1  ;;  %s3500_s11 = int_to_ptr.hbm [resolvable:$true] %s832_s11 }
  0x55   : > { %s3503_s7 = sshll.u32 %s3277_s18, 4  ;;  %s835_s7 = int_to_ptr.vmem [resolvable:$true] %s3503_s7 }
  0x56   : > { %p3508_p8 = pneg %p3496_p6 }
  0x57   : > { %s815_s0 = sshll.u32 %s3936_s8, 4  ;;  %s2862_s3 = scalar_lea.hbm %s3936_s8, 32  ;;  %s3475_s0 = int_to_ptr.hbm [resolvable:$true] %s815_s0 }
  0x58   : > { %s2855_s4 = sshra.s32 %s3475_s0, 4  ;;  %s2856_s4 = int_to_ptr.hbm [resolvable:$true] %s2855_s4 }
  0x59   : > { %s2857_s20 = scalar_lea.hbm %s2856_s4, 32  ;;  %p2863_p11 = scmp.lt.s32.totalorder %s2856_s4, %s3936_s8 }
  0x5a   : > { %p2858_p7 = scmp.ne.s32.totalorder %s2856_s4, %s2857_s20  ;;  %p2864_p12 = scmp.lt.s32.totalorder %s2862_s3, %s2857_s20 }
  0x5c   : > { %p2860_p9 = pnand %p3508_p8, %p2858_p7  ;;  %p2865_p13 = por %p2864_p12, %p2863_p11 }
  0x5e   : > { %p2861_p10 = pneg %p2860_p9 }
  0x60   : > { %p2866_p0 = pnand %p2865_p13, %p2861_p10 }
  0x62   : > { %2869 = shalt.err (!%p2866_p0)
}
  0x63   : > { %s3278_s18 = smov 128   ;;  %s3279_s21 = smov 8  }
  0x64   : > { %2673 = dma.hbm_to_vmem [thread:$0]  (!%p3496_p6), %s3475_s0, 512, %s818_s10, [#allocation6], %s3278_s18, %s3278_s18, %s3279_s21  }
  0x65   : > { %s2885_s3 = sshra.s32 %s3500_s11, 4  ;;  %s2892_s4 = scalar_lea.hbm %s3933_s19, 32  ;;  %s2886_s3 = int_to_ptr.hbm [resolvable:$true] %s2885_s3 }
  0x66   : > { %s2887_s20 = scalar_lea.hbm %s2886_s3, 32  ;;  %p2893_p9 = scmp.lt.s32.totalorder %s2886_s3, %s3933_s19 }
  0x67   : > { %p2888_p2 = scmp.ne.s32.totalorder %s2886_s3, %s2887_s20  ;;  %p2894_p10 = scmp.lt.s32.totalorder %s2892_s4, %s2887_s20 }
  0x69   : > { %p2890_p4 = pnand %p2888_p2, %p3508_p8  ;;  %p2895_p11 = por %p2894_p10, %p2893_p9 }
  0x6b   : > { %p2891_p7 = pneg %p2890_p4 }
  0x6d   : > { %p2896_p12 = pnand %p2895_p11, %p2891_p7 }
  0x6f   : > { %2899 = shalt.err (!%p2896_p12)
}
  0x70   : > { %2676 = dma.hbm_to_vmem [thread:$0]  (!%p3496_p6), %s3500_s11, 512, %s835_s7, [#allocation9], %s3278_s18, %s3278_s18, %s3279_s21  }
  0x71   : > { %s918_s0 = sshll.u32 %s3935_s12, 4  ;;  %s3280_s10 = smov [#allocation11]   ;;  %s3537_s0 = int_to_ptr.hbm [resolvable:$true] %s918_s0 }
  0x72   : > { %s862_s8 = sshll.u32 %s3280_s10, 4  ;;  %s2915_s3 = sshra.s32 %s3523_s16, 4  ;;  %s863_s8 = int_to_ptr.vmem [resolvable:$true] %s862_s8  ;;  %s2916_s3 = int_to_ptr.hbm [resolvable:$true] %s2915_s3 }
  0x73   : > { %s2917_s20 = scalar_lea.hbm %s2916_s3, 32  ;;  %s2922_s4 = scalar_lea.hbm %s3930_s30, 32 }
  0x74   : > { %p2918_p13 = scmp.ne.s32.totalorder %s2916_s3, %s2917_s20  ;;  %p2923_p4 = scmp.lt.s32.totalorder %s2916_s3, %s3930_s30 }
  0x75   : > { %p2924_p7 = scmp.lt.s32.totalorder %s2922_s4, %s2917_s20 }
  0x76   : > { %p2920_p0 = pnand %p2918_p13, %p3508_p8 }
  0x77   : > { %p2925_p9 = por %p2924_p7, %p2923_p4 }
  0x78   : > { %p2921_p2 = pneg %p2920_p0 }
  0x7a   : > { %p2926_p10 = pnand %p2925_p9, %p2921_p2 }
  0x7c   : > { %2929 = shalt.err (!%p2926_p10)
}
  0x7d   : > { %2682 = dma.hbm_to_vmem [thread:$0]  (!%p3496_p6), %s3523_s16, 512, %s863_s8, [#allocation12], %s3278_s18, %s3278_s18, %s3279_s21  }
  0x7e   : > { %s3281_s11 = smov [#allocation14]   ;;  %s846_s10 = sshll.u32 %s3932_s24, 4  ;;  %s3551_s10 = int_to_ptr.hbm [resolvable:$true] %s846_s10 }
  0x7f   : > { %s920_s7 = sshll.u32 %s3281_s11, 4  ;;  %s2945_s3 = sshra.s32 %s3537_s0, 4  ;;  %s921_s7 = int_to_ptr.vmem [resolvable:$true] %s920_s7  ;;  %s2946_s3 = int_to_ptr.hbm [resolvable:$true] %s2945_s3 }
  0x80   : > { %s2947_s20 = scalar_lea.hbm %s2946_s3, 32  ;;  %s2952_s4 = scalar_lea.hbm %s3935_s12, 32 }
  0x81   : > { %p2948_p11 = scmp.ne.s32.totalorder %s2946_s3, %s2947_s20  ;;  %p2953_p0 = scmp.lt.s32.totalorder %s2946_s3, %s3935_s12 }
  0x82   : > { %p2954_p2 = scmp.lt.s32.totalorder %s2952_s4, %s2947_s20 }
  0x83   : > { %p2950_p12 = pnand %p2948_p11, %p3508_p8 }
  0x84   : > { %p2955_p4 = por %p2954_p2, %p2953_p0 }
  0x85   : > { %p2951_p13 = pneg %p2950_p12 }
  0x87   : > { %p2956_p7 = pnand %p2955_p4, %p2951_p13 }
  0x89   : > { %2959 = shalt.err (!%p2956_p7)
}
  0x8a   : > { %2688 = dma.hbm_to_vmem [thread:$0]  (!%p3496_p6), %s3537_s0, 512, %s921_s7, [#allocation15], %s3278_s18, %s3278_s18, %s3279_s21  }
  0x8b   : > { %s883_s8 = sshll.u32 %s3931_s27, 4  ;;  %s3282_s16 = smov [#allocation10]   ;;  %s3565_s8 = int_to_ptr.hbm [resolvable:$true] %s883_s8 }
  0x8c   : > { %s848_s11 = sshll.u32 %s3282_s16, 4  ;;  %s2975_s3 = sshra.s32 %s3551_s10, 4  ;;  %s849_s11 = int_to_ptr.vmem [resolvable:$true] %s848_s11  ;;  %s2976_s3 = int_to_ptr.hbm [resolvable:$true] %s2975_s3 }
  0x8d   : > { %s2977_s20 = scalar_lea.hbm %s2976_s3, 32  ;;  %s2982_s4 = scalar_lea.hbm %s3932_s24, 32 }
  0x8e   : > { %p2978_p9 = scmp.ne.s32.totalorder %s2976_s3, %s2977_s20  ;;  %p2983_p12 = scmp.lt.s32.totalorder %s2976_s3, %s3932_s24 }
  0x8f   : > { %p2984_p13 = scmp.lt.s32.totalorder %s2982_s4, %s2977_s20 }
  0x90   : > { %p2980_p10 = pnand %p2978_p9, %p3508_p8 }
  0x91   : > { %p2985_p0 = por %p2984_p13, %p2983_p12 }
  0x92   : > { %p2981_p11 = pneg %p2980_p10 }
  0x94   : > { %p2986_p2 = pnand %p2985_p0, %p2981_p11 }
  0x96   : > { %2989 = shalt.err (!%p2986_p2)
}
  0x97   : > { %2679 = dma.hbm_to_vmem [thread:$0]  (!%p3496_p6), %s3551_s10, 512, %s849_s11, [#allocation9], %s3278_s18, %s3278_s18, %s3279_s21  }
  0x98   : > { %s3283_s0 = smov [#allocation13]   ;;  %s941_s16 = sshll.u32 %s3934_s14, 4  ;;  %s3579_s16 = int_to_ptr.hbm [resolvable:$true] %s941_s16 }
  0x99   : > { %s885_s7 = sshll.u32 %s3283_s0, 4  ;;  %s3005_s3 = sshra.s32 %s3565_s8, 4  ;;  %s886_s7 = int_to_ptr.vmem [resolvable:$true] %s885_s7  ;;  %s3006_s3 = int_to_ptr.hbm [resolvable:$true] %s3005_s3 }
  0x9a   : > { %s3007_s20 = scalar_lea.hbm %s3006_s3, 32  ;;  %s3012_s4 = scalar_lea.hbm %s3931_s27, 32 }
  0x9b   : > { %p3008_p4 = scmp.ne.s32.totalorder %s3006_s3, %s3007_s20  ;;  %p3013_p10 = scmp.lt.s32.totalorder %s3006_s3, %s3931_s27 }
  0x9c   : > { %p3014_p11 = scmp.lt.s32.totalorder %s3012_s4, %s3007_s20 }
  0x9d   : > { %p3010_p7 = pnand %p3008_p4, %p3508_p8 }
  0x9e   : > { %p3015_p12 = por %p3014_p11, %p3013_p10 }
  0x9f   : > { %p3011_p9 = pneg %p3010_p7 }
  0xa1   : > { %p3016_p13 = pnand %p3015_p12, %p3011_p9 }
  0xa3   : > { %3019 = shalt.err (!%p3016_p13)
}
  0xa4   : > { %2685 = dma.hbm_to_vmem [thread:$0]  (!%p3496_p6), %s3565_s8, 512, %s886_s7, [#allocation12], %s3278_s18, %s3278_s18, %s3279_s21  }
  0xa5   : > { %s3284_s10 = smov [#allocation16]   ;;  %s3035_s0 = sshra.s32 %s3579_s16, 4  ;;  %s3036_s0 = int_to_ptr.hbm [resolvable:$true] %s3035_s0 }
  0xa6   : > { %s943_s11 = sshll.u32 %s3284_s10, 4  ;;  %s3037_s3 = scalar_lea.hbm %s3036_s0, 32  ;;  %s944_s11 = int_to_ptr.vmem [resolvable:$true] %s943_s11 }
  0xa7   : > { %p3038_p0 = scmp.ne.s32.totalorder %s3036_s0, %s3037_s3  ;;  %s3042_s20 = scalar_lea.hbm %s3934_s14, 32 }
  0xa8   : > { %p3043_p7 = scmp.lt.s32.totalorder %s3036_s0, %s3934_s14  ;;  %p3044_p9 = scmp.lt.s32.totalorder %s3042_s20, %s3037_s3 }
  0xa9   : > { %p3040_p2 = pnand %p3038_p0, %p3508_p8 }
  0xaa   : > { %p3045_p10 = por %p3044_p9, %p3043_p7 }
  0xab   : > { %p3041_p4 = pneg %p3040_p2 }
  0xad   : > { %p3046_p11 = pnand %p3045_p10, %p3041_p4 }
  0xaf   : > { %3049 = shalt.err (!%p3046_p11)
}
  0xb0   : > { %2691 = dma.hbm_to_vmem [thread:$0]  (!%p3496_p6), %s3579_s16, 512, %s944_s11, [#allocation15], %s3278_s18, %s3278_s18, %s3279_s21  }
  0xb1   : > { %s2561_s6 = sadd.s32 4294967294, %s3243_s28   ;;  %s3605_s15 = sadd.s32 1, %s3243_s28  }
  0xb2   : > { %s96_s8 = sadd.s32 1, %s3239_s26  ;;  %s93_s7 = ssub.s32 %s3243_s28, %s3605_s15 }
  0xb3   : > { %p103_p8 = scmp.ne.s32.totalorder %s3239_s26, %s3235_s23  ;;  %p94_p12 = scmp.eq.s32.totalorder %s93_s7, 0 }
  0xb4   : > { %p104_p13 = scmp.eq.s32.totalorder %s3243_s28, 0  ;;  %p109_p0 = scmp.ne.s32.totalorder %s3235_s23, %s3231_s22 }
  0xb5   : > { %p747_p2 = scmp.eq.s32.totalorder %s3478_s1, 1  ;;  %p753_p9 = scmp.eq.s32.totalorder %s2561_s6, 1 }
  0xb6   : > { %s3617_s4 = scalar_select %p94_p12, %s3239_s26, %s96_s8  }
  0xb7   : > { %p3619_p4 = por %p104_p13, %p103_p8  ;;  %p3625_p6 = por %p110_p1, %p109_p0 }
  0xb8   : > { %3941 = sst [smem:[#allocation55_spill]] %s3617_s4  ;;  %p3629_p7 = por %p747_p2, %p103_p8 }
  0xb9   : > { %p2713_p10 = scmp.lt.s32.totalorder %s3243_s28, 2  ;;  %s960_s16 = sand.u32 1, %s3239_s26  }
  0xba   : > { %p3635_p11 = por %p753_p9, %p109_p0  ;;  %s2571_s0 = sshll.u32 %s960_s16, 3 }
  0xbb   : > { %s2572_s3 = sshll.u32 %s3243_s28, 3  ;;  %s964_s7 = scalar_lea.vmem [#allocation2], %s2571_s0 }
  0xbc   : > { %s968_s20 = scalar_lea.hbm %s3297_s5, %s2572_s3  ;;  %s972_s12 = sshll.u32 %s964_s7, 4  ;;  %s973_s12 = int_to_ptr.vmem [resolvable:$true] %s972_s12 }
  0xbd   : > { %s970_s8 = sshll.u32 %s968_s20, 4  ;;  %p3643_p8 = pnand %p2713_p10, %p3619_p4  ;;  %s971_s8 = int_to_ptr.hbm [resolvable:$true] %s970_s8 }
  0xbe   : > { %s987_s6 = scalar_lea.hbm %s3302_s9, %s2572_s3  ;;  %s979_s19 = sand.u32 1, %s3243_s28  }
  0xbf   : > { %s961_s24 = scalar_lea.sflag [#allocation3], %s960_s16  ;;  %s3065_s27 = sshra.s32 %s971_s8, 4  ;;  %s3066_s27 = int_to_ptr.hbm [resolvable:$true] %s3065_s27 }
  0xc0   : > { %s3067_s30 = scalar_lea.hbm %s3066_s27, 8  ;;  %p3069_p13 = pneg %p3643_p8 }
  0xc1   : > { %p3068_p12 = scmp.ne.s32.totalorder %s3066_s27, %s3067_s30  ;;  %s3072_s10 = scalar_lea.hbm %s3297_s5, 16 }
  0xc2   : > { %p3073_p4 = scmp.lt.s32.totalorder %s3066_s27, %s3297_s5  ;;  %p3074_p9 = scmp.lt.s32.totalorder %s3072_s10, %s3067_s30 }
  0xc3   : > { %p3070_p0 = pnand %p3069_p13, %p3068_p12 }
  0xc4   : > { %p3075_p10 = por %p3074_p9, %p3073_p4 }
  0xc5   : > { %p3071_p2 = pneg %p3070_p0 }
  0xc7   : > { %p3076_p5 = pnand %p3075_p10, %p3071_p2 }
  0xc9   : > { %3079 = shalt.err (!%p3076_p5)
}
  0xca   : > { %2695 = dma.hbm_to_vmem [thread:$0]  (!%p3643_p8), %s971_s8, 128, %s973_s12, %s961_s24  }
  0xcb   : > { %s989_s16 = sshll.u32 %s987_s6, 4  ;;  %s983_s3 = scalar_lea.vmem [#allocation5], %s2571_s0  ;;  %s990_s16 = int_to_ptr.hbm [resolvable:$true] %s989_s16 }
  0xcc   : > { %s991_s20 = sshll.u32 %s983_s3, 4  ;;  %s980_s7 = scalar_lea.sflag [#allocation6], %s979_s19  ;;  %s992_s20 = int_to_ptr.vmem [resolvable:$true] %s991_s20 }
  0xcd   : > { %s3095_s4 = sshra.s32 %s990_s16, 4  ;;  %s3102_s30 = scalar_lea.hbm %s3302_s9, 16  ;;  %s3096_s4 = int_to_ptr.hbm [resolvable:$true] %s3095_s4 }
  0xce   : > { %s3097_s26 = scalar_lea.hbm %s3096_s4, 8  ;;  %p3103_p2 = scmp.lt.s32.totalorder %s3096_s4, %s3302_s9 }
  0xcf   : > { %p3098_p12 = scmp.ne.s32.totalorder %s3096_s4, %s3097_s26  ;;  %p3104_p4 = scmp.lt.s32.totalorder %s3102_s30, %s3097_s26 }
  0xd1   : > { %p3100_p0 = pnand %p3098_p12, %p3069_p13  ;;  %p3105_p9 = por %p3104_p4, %p3103_p2 }
  0xd3   : > { %p3101_p5 = pneg %p3100_p0 }
  0xd5   : > { %p3106_p10 = pnand %p3105_p9, %p3101_p5 }
  0xd7   : > { %3109 = shalt.err (!%p3106_p10)
}
  0xd8   : > { %2698 = dma.hbm_to_vmem [thread:$0]  (!%p3643_p8), %s990_s16, 128, %s992_s20, %s980_s7  }
  0xd9   : > { %1000 = sbr.rel (%p3483_p3) target bundleno = 4121 (0x1019), region = 140  ;;  %s3668_s19 = sand.u32 (!%p3483_p3), 1, %s3235_s23  }
  0xda   : > { %s3671_s24 = sshll.u32 (!%p3483_p3), %s3668_s19, 3  ;;  %s1003_s12 = scalar_lea.sflag (!%p3483_p3), [#allocation3], %s3668_s19 }
  0xdb   : > { %s1006_s27 = scalar_lea.vmem (!%p3483_p3), [#allocation2], %s3671_s24 }
  0xde   : > { %3198 = dma.done.wait (%p3625_p6), %s1003_s12, 128  }
  0xdf   : > { %3200 = vsyncadd (%p3625_p6), %s1003_s12, 4294967168  ;;  %s1012_s14 = sand.u32 1, %s3478_s1   ;;  %s1016_s2 = scalar_lea.vmem [#allocation5], %s3671_s24 }
  0xe0   : > { %s1013_s26 = scalar_lea.sflag [#allocation6], %s1012_s14 }
  0xe1   : > { %3202 = dma.done.wait (%p3625_p6), %s1013_s26, 128  }
  0xe2   : > { %3204 = vsyncadd (%p3625_p6), %s1013_s26, 4294967168 }
  0xe3   : > { %3206 = dma.done.wait (%p110_p1), [#allocation6], 512  }
  0xe4   : > { %3208 = vsyncadd (%p110_p1), [#allocation6], 4294966784 }
  0xe5   : > { %3210 = dma.done.wait (%p110_p1), [#allocation9], 1024  }
  0xe6   : > { %3212 = vsyncadd (%p110_p1), [#allocation9], 4294966272 }
  0xe7   : > { %3214 = dma.done.wait (%p110_p1), [#allocation12], 1024  }
  0xe8   : > { %3216 = vsyncadd (%p110_p1), [#allocation12], 4294966272 }
  0xe9   : > { %3218 = dma.done.wait (%p110_p1), [#allocation15], 1024  }
  0xea   : > { %3220 = vsyncadd (%p110_p1), [#allocation15], 4294966272  ;;  %v1184_v0 = vld [vmem:[%s3312_s17 + $0x18] sm:$0xff]  ;;  %v1183_v2 = vld [vmem:[%s3312_s17 + $0x10] sm:$0xff]  ;;  %vm1157_vm0 = vcmask 261120   ;;  %vm1238_vm1 = vcmask 64512  }
  0xeb   : > { %v1152_v1 = vld [vmem:[%s3307_s13 + $0x18] sm:$0xff]  ;;  %1201 = vmatpush.msra.mxu1 %v1184_v0  ;;  %v1151_v3 = vld [vmem:[%s3307_s13 + $0x10] sm:$0xff]  ;;  %v1182_v4 = vld [vmem:[%s3312_s17 + $0x8] sm:$0xff]  ;;  %s3285_s4 = smov 112   ;;  %s3286_s21 = smov 120   ;;  %vm2215_vm9 = vcmask 523264  }
  0xec   : > { %1173 = vmatpush.msra.mxu0 %v1152_v1  ;;  %v1150_v5 = vld [vmem:[%s3307_s13 + $0x8] sm:$0xff]  ;;  %v1181_v6 = vld [vmem:[%s3312_s17] sm:$0xff]  ;;  %s3947_s0 = sld [smem:[#allocation28_spill]]  ;;  %s3287_s8 = smov 104  }
  0xed   : > { %v1149_v7 = vld [vmem:[%s3307_s13] sm:$0xff]  ;;  %1202 = vmatpush.msra.mxu1 %v1183_v2  ;;  %s3948_s6 = sld [smem:[#allocation29_spill]] }
  0xee   : > { %1174 = vmatpush.msra.mxu0 %v1151_v3  ;;  %v3709_v8 = vld [vmem:[%s1006_s27] sm:$0xff]  ;;  %s3949_s10 = sld [smem:[#allocation31_spill]] }
  0xef   : > { %1203 = vmatpush.msra.mxu1 %v1182_v4  ;;  %v2798_v9 = vld [vmem:[%s3327_s29] ss:$0 sm:$0xff]  ;;  %s3950_s16 = sld [smem:[#allocation40_spill]] }
  0xf0   : > { %1175 = vmatpush.msra.mxu0 %v1150_v5  ;;  %v2799_v10 = vld [vmem:[%s3322_s25] ss:$0 sm:$0xff]  ;;  %s3951_s3 = sld [smem:[#allocation41_spill]] }
  0xf1   : > { %1204 = vmatpush.msra.mxu1 %v1181_v6  ;;  %v1305_v39 = vld [vmem:[#allocation7] sm:$0xff]  ;;  %s3952_s20 = sld [smem:[#allocation36_spill]] }
  0xf2   : > { %1176 = vmatpush.msra.mxu0 %v1149_v7  ;;  %2588 = vmatmul.msk.f32.vlgmr.msra.gmra.mxu1 %vm1157_vm0, %v3709_v8  ;;  %v1212_v21 = vld [vmem:[%s3947_s0 + $0x18] sm:$0xff]  ;;  %v1211_v22 = vld [vmem:[%s3947_s0 + $0x10] sm:$0xff]  ;;  %v1210_v23 = vld [vmem:[%s3947_s0 + $0x8] sm:$0xff]  ;;  %s3953_s7 = sld [smem:[#allocation35_spill]] }
  0xf3   : > { %2587 = vmatmul.msk.f32.vlgmr.msra.gmra.mxu0 %vm1157_vm0, %v3709_v8  ;;  %1229 = vmatpush.msra.mxu2 %v1212_v21  ;;  %v1209_v24 = vld [vmem:[%s3947_s0] sm:$0xff]  ;;  %s3954_s30 = sld [smem:[#allocation37_spill]] }
  0xf4   : > { %v2800_v33 = vld [vmem:[%s3948_s6] ss:$0 sm:$0xff]  ;;  %s3955_s12 = sld [smem:[#allocation39_spill]] }
  0xf5   : > { %1230 = vmatpush.msra.mxu2 %v1211_v22  ;;  %s3956_s27 = sld [smem:[#allocation48_spill]] }
  0xf6   : > { %s3957_s14 = sld [smem:[#allocation42_spill]] }
  0xf7   : > { %1231 = vmatpush.msra.mxu2 %v1210_v23  ;;  %s3958_s26 = sld [smem:[#allocation43_spill]] }
  0xf8   : > { %s3963_s6 = sld [smem:[#allocation52_spill]] }
  0xf9   : > { %1232 = vmatpush.msra.mxu2 %v1209_v24 }
  0xfa   : > { %2589 = vmatmul.msk.f32.vlgmr.msra.gmra.mxu2 %vm1157_vm0, %v3709_v8 }
 0x16f   : > { %v1206_v11 = vpop.f32.mrf.mxu1 }
 0x170   : > { %v1178_v12 = vpop.f32.mrf.mxu0  ;;  %v1207_v13 = vadd.f32 %v2798_v9, %v1206_v11 }
 0x171   : > { %v1179_v14 = vadd.f32 %v2799_v10, %v1178_v12 }
 0x172   : > { %1428 = vrot.lane.b32.xlu2 %v1207_v13, %s3285_s4  ;;  %1308 = vrot.lane.b32.xlu1 %v1207_v13, %s3286_s21 }
 0x173   : > { %v1237_v15 = vmul.f32 0.35355338, %v1179_v14  ;;  %2590 = vmatpush.xpose.msk.msra.mxu3 %vm1238_vm1, %v1207_v13 }
 0x176   : > { %2591 = vmatmul.msk.f32.vlgmr.msra.gmra.mxu3 %vm1238_vm1, %v1237_v15 }
 0x17a   : > { %1525 = vrot.lane.b32.xlu2 %v1207_v13, %s3287_s8  ;;  %1306 = vrot.lane.b32.xlu1 %v1237_v15, %s3286_s21 }
 0x17d   : > { %v1234_v35 = vpop.f32.mrf.mxu2 }
 0x17e   : > { %v3738_v37 = vadd.f32 %v2800_v33, %v1234_v35 }
 0x180   : > { %1300 = vmatpush.msrb.mxu3 %v3738_v37 }
 0x182   : > { %1523 = vrot.lane.b32.xlu1 %v1237_v15, %s3287_s8  ;;  %1421 = vmatpush.msra.mxu3 %v1305_v39  ;;  %v1498_v39 = vld [vmem:[#allocation7 + $0x10] sm:$0xff] }
 0x1cc   : > { %v1429_v17 = vpop.permute.xlu2 %1428 }
 0x1d4   : > { %v1526_v32 = vpop.permute.xlu2 %1525 }
 0x1e4   : > { %v1309_v16 = vpop.permute.xlu1 %1308 }
 0x1e5   : > { %2593 = vmatpush.xpose.msk.msrb.mxu0 %vm1238_vm1, %v1309_v16 }
 0x1e9   : > { %2598 = vmatpush.xpose.msk.msra.mxu0 %vm1238_vm1, %v1429_v17 }
 0x1ec   : > { %v1307_v18 = vpop.permute.xlu1 %1306 }
 0x1ed   : > { %2594 = vmatmul.msk.f32.vlgmr.msrb.gmra.mxu0 %vm1238_vm1, %v1307_v18  ;;  %v1379_v18 = vld [vmem:[#allocation7 + $0x8] sm:$0xff] }
 0x1ee   : > { %1398 = vmatpush.msrb.mxu2 %v1379_v18  ;;  %v2802_v18 = vld [vmem:[%s3950_s16] ss:$0 sm:$0xff]  ;;  %s2630_s16 = sshll.u32 %s3478_s1, 3 }
 0x1f0   : > { %1517 = vmatpush.msra.mxu2 %v1498_v39 }
 0x1f4   : > { %v1524_v55 = vpop.permute.xlu1 %1523 }
 0x1f9   : > { %v1262_v19 = vpop.f32.mrf.mxu3 }
 0x1fa   : > { %v1265_v20 = vsel %vm1238_vm1, %v1262_v19, -inf }
 0x1fb   : > { %1266 = vmax.xlane.f32.xlu0 %v1265_v20 }
 0x26a   : > { %v1331_v25 = vpop.f32.mrf.mxu0 }
 0x26b   : > { %v1334_v26 = vsel %vm1238_vm1, %v1331_v25, -inf }
 0x26c   : > { %1335 = vmax.xlane.f32.xlu2 %v1334_v26 }
 0x26e   : > { %v1267_v27 = vpop.xlane.xlu0 %1266 }
 0x26f   : > { %v1268_v28 = vsub.f32 %v1262_v19, %v1267_v27 }
 0x271   : > { %v1269_v29 = vmul.f32 1.442695, %v1268_v28 }
 0x273   : > { %2815 = vpow2.f32 %v1269_v29 }
 0x279   : > { %v2816_v30 = vpop.eup %2815 }
 0x27a   : > { %v1271_v31 = vsel %vm1238_vm1, %v2816_v30, 0.0 }
 0x27b   : > { %1272 = vadd.xlane.f32.xlu0 %v1271_v31 }
 0x28f   : > { %1426 = vrot.lane.b32.xlu0 %v1237_v15, %s3285_s4 }
 0x2df   : > { %v1336_v34 = vpop.xlane.xlu2 %1335 }
 0x2e0   : > { %v1337_v36 = vsub.f32 %v1331_v25, %v1336_v34 }
 0x2e2   : > { %v1338_v38 = vmul.f32 1.442695, %v1337_v36 }
 0x2e4   : > { %2817 = vpow2.f32 %v1338_v38  ;;  %v1595_v38 = vld [vmem:[#allocation7 + $0x18] sm:$0xff] }
 0x2ea   : > { %v2818_v40 = vpop.eup %2817 }
 0x2eb   : > { %v1340_v41 = vsel %vm1238_vm1, %v2818_v40, 0.0 }
 0x2ec   : > { %1341 = vadd.xlane.f32.xlu2 %v1340_v41 }
 0x2ee   : > { %v1273_v42 = vpop.xlane.xlu0 %1272 }
 0x2ef   : > { %2819 = vrcp.f32 %v1273_v42 }
 0x2f5   : > { %v2820_v43 = vpop.eup %2819 }
 0x2f6   : > { %v1275_v44 = vmul.f32 %v2820_v43, %v1273_v42 }
 0x2f8   : > { %v1276_v45 = vsub.f32 2.0, %v1275_v44 }
 0x2fa   : > { %v1277_v46 = vmul.f32 %v2820_v43, %v1276_v45 }
 0x2fc   : > { %v1278_v47 = vmul.f32 %v1277_v46, %v1273_v42 }
 0x2fe   : > { %v1279_v48 = vsub.f32 2.0, %v1278_v47 }
 0x300   : > { %v1280_v49 = vmul.f32 %v1279_v48, %v1277_v46  ;;  %v2801_v46 = vld [vmem:[%s3949_s10] ss:$0 sm:$0xff]  ;;  %s1133_s10 = scalar_lea.vmem [#allocation17], %s3671_s24 }
 0x301   : > { %v1427_v50 = vpop.permute.xlu0 %1426 }
 0x302   : > { %2599 = vmatmul.msk.f32.vlgmr.msra.gmra.mxu0 %vm1238_vm1, %v1427_v50  ;;  %v1281_v51 = vmul.f32 %v2816_v30, %v1280_v49 }
 0x304   : > { %2592 = vmatmul.msk.f32.vlgmr.msrb.gmra.mxu3 %vm1238_vm1, %v1281_v51 }
 0x305   : > { %2602 = vmatpush.xpose.msk.msrb.mxu3 %vm1238_vm1, %v1526_v32 }
 0x35f   : > { %v1342_v0 = vpop.xlane.xlu2 %1341 }
 0x37f   : > { %v1451_v52 = vpop.f32.mrf.mxu0 }
 0x380   : > { %v1454_v53 = vsel %vm1238_vm1, %v1451_v52, -inf }
 0x381   : > { %1455 = vmax.xlane.f32.xlu1 %v1454_v53 }
 0x387   : > { %v1302_v54 = vpop.f32.mrf.mxu3 }
 0x388   : > { %2597 = vmatmul.msk.f32.vlgmr.msra.gmra.mxu3 %vm1238_vm1, %v1302_v54 }
 0x390   : > { %2603 = vmatmul.msk.f32.vlgmr.msrb.gmra.mxu3 %vm1238_vm1, %v1524_v55 }
 0x3f4   : > { %v1456_v56 = vpop.xlane.xlu1 %1455 }
 0x3f5   : > { %v1457_v57 = vsub.f32 %v1451_v52, %v1456_v56  ;;  %v3288_v52 = vmov 32.0  }
 0x3f7   : > { %v1458_v58 = vmul.f32 1.442695, %v1457_v57 }
 0x3f9   : > { %2821 = vpow2.f32 %v1458_v58 }
 0x3fa   : > { %2823 = vrcp.f32 %v1342_v0 }
 0x3ff   : > { %v2822_v59 = vpop.eup %2821 }
 0x400   : > { %v1460_v60 = vsel %vm1238_vm1, %v2822_v59, 0.0  ;;  %v2824_v1 = vpop.eup %2823 }
 0x401   : > { %1461 = vadd.xlane.f32.xlu2 %v1460_v60  ;;  %v1344_v2 = vmul.f32 %v2824_v1, %v1342_v0 }
 0x403   : > { %v1345_v3 = vsub.f32 2.0, %v1344_v2  ;;  %v1666_v2 = vld [vmem:[#allocation8 + $0x18] sm:$0xff] }
 0x405   : > { %v1346_v4 = vmul.f32 %v2824_v1, %v1345_v3  ;;  %v1695_v1 = vld [vmem:[#allocation10 + $0x8] sm:$0xff]  ;;  %v1694_v3 = vld [vmem:[#allocation10] sm:$0xff] }
 0x407   : > { %v1347_v5 = vmul.f32 %v1346_v4, %v1342_v0  ;;  %v1696_v0 = vld [vmem:[#allocation10 + $0x10] sm:$0xff] }
 0x409   : > { %v1348_v6 = vsub.f32 2.0, %v1347_v5  ;;  %v1665_v5 = vld [vmem:[#allocation8 + $0x10] sm:$0xff] }
 0x40b   : > { %v3749_v61 = vpop.f32.mrf.mxu3  ;;  %v1349_v9 = vmul.f32 %v1348_v6, %v1346_v4  ;;  %v1148_v4 = vld [vmem:[%s1016_s2] sm:$0xff]  ;;  %v1664_v6 = vld [vmem:[#allocation8 + $0x8] sm:$0xff]  ;;  %s3959_s2 = sld [smem:[#allocation47_spill]] }
 0x40d   : > { %v1350_v11 = vmul.f32 %v2818_v40, %v1349_v9 }
 0x413   : > { %v1548_v62 = vpop.f32.mrf.mxu3 }
 0x414   : > { %v1551_v63 = vsel %vm1238_vm1, %v1548_v62, -inf }
 0x415   : > { %1552 = vmax.xlane.f32.xlu0 %v1551_v63  ;;  %v1697_v63 = vld [vmem:[#allocation10 + $0x18] sm:$0xff] }
 0x416   : > { %1717 = vmatpush.msra.mxu3 %v1697_v63 }
 0x418   : > { %1718 = vmatpush.msra.mxu3 %v1696_v0 }
 0x419   : > { %1352 = vrot.lane.b32.xlu2 %v3738_v37, %s3286_s21 }
 0x41a   : > { %1719 = vmatpush.msra.mxu3 %v1695_v1 }
 0x41c   : > { %1720 = vmatpush.msra.mxu3 %v1694_v3 }
 0x41d   : > { %2607 = vmatmul.msk.f32.vlgmr.msra.gmra.mxu3 %vm1157_vm0, %v1148_v4 }
 0x429   : > { %1568 = vrot.lane.b32.xlu0 %v3738_v37, %s3287_s8 }
 0x474   : > { %v1462_v7 = vpop.xlane.xlu2 %1461 }
 0x47c   : > { %v1353_v10 = vpop.permute.xlu2 %1352 }
 0x47d   : > { %1373 = vmatpush.msrb.mxu1 %v1353_v10 }
 0x47e   : > { %2595 = vmatmul.msk.f32.vlgmr.msrb.gmra.mxu1 %vm1238_vm1, %v1350_v11 }
 0x488   : > { %v1553_v12 = vpop.xlane.xlu0 %1552 }
 0x489   : > { %v1554_v13 = vsub.f32 %v1548_v62, %v1553_v12 }
 0x48b   : > { %v1555_v14 = vmul.f32 1.442695, %v1554_v13 }
 0x48d   : > { %2825 = vpow2.f32 %v1555_v14 }
 0x48e   : > { %2827 = vrcp.f32 %v1462_v7 }
 0x493   : > { %v2826_v15 = vpop.eup %2825 }
 0x494   : > { %v1557_v16 = vsel %vm1238_vm1, %v2826_v15, 0.0  ;;  %v2828_v20 = vpop.eup %2827 }
 0x495   : > { %1558 = vadd.xlane.f32.xlu1 %v1557_v16  ;;  %v1464_v21 = vmul.f32 %v2828_v20, %v1462_v7 }
 0x497   : > { %v1465_v23 = vsub.f32 2.0, %v1464_v21  ;;  %v2803_v21 = vld [vmem:[%s3951_s3] ss:$0 sm:$0xff]  ;;  %s2319_s3 = scalar_lea.hbm %s3963_s6, %s2630_s16 }
 0x499   : > { %v1466_v25 = vmul.f32 %v2828_v20, %v1465_v23 }
 0x49b   : > { %v1569_v17 = vpop.permute.xlu0 %1568  ;;  %v1467_v28 = vmul.f32 %v1466_v25, %v1462_v7  ;;  %v1663_v7 = vld [vmem:[#allocation8] sm:$0xff] }
 0x49c   : > { %1589 = vmatpush.msrb.mxu0 %v1569_v17 }
 0x49d   : > { %v1468_v31 = vsub.f32 2.0, %v1467_v28 }
 0x49f   : > { %v1469_v34 = vmul.f32 %v1468_v31, %v1466_v25 }
 0x4a0   : > { %v1722_v25 = vpop.f32.mrf.mxu3 }
 0x4a1   : > { %v1470_v36 = vmul.f32 %v2822_v59, %v1469_v34  ;;  %v1728_v34 = vld [vmem:[#allocation11 + $0x18] sm:$0xff] }
 0x4a2   : > { %1745 = vmatpush.msra.mxu0 %v1728_v34 }
 0x4ae   : > { %1471 = vrot.lane.b32.xlu1 %v3738_v37, %s3285_s4 }
 0x4fb   : > { %v1375_v19 = vpop.f32.mrf.mxu1 }
 0x4fc   : > { %2596 = vmatmul.msk.f32.vlgmr.msrb.gmra.mxu2 %vm1238_vm1, %v1375_v19 }
 0x4fd   : > { %1686 = vmatpush.msrb.mxu2 %v1666_v2 }
 0x4ff   : > { %1687 = vmatpush.msrb.mxu2 %v1665_v5 }
 0x501   : > { %1688 = vmatpush.msrb.mxu2 %v1664_v6 }
 0x503   : > { %1689 = vmatpush.msrb.mxu2 %v1663_v7 }
 0x508   : > { %v1559_v22 = vpop.xlane.xlu1 %1558 }
 0x509   : > { %2829 = vrcp.f32 %v1559_v22 }
 0x50a   : > { %2831 = vrcp.f32 %v3288_v52 }
 0x50f   : > { %v2830_v24 = vpop.eup %2829 }
 0x510   : > { %v1561_v26 = vmul.f32 %v2830_v24, %v1559_v22  ;;  %v2832_v53 = vpop.eup %2831 }
 0x511   : > { %v1630_v54 = vmul.f32 32.0, %v2832_v53  ;;  %vm1634_vm2 = vweird.f32 %v2832_v53 }
 0x512   : > { %v1562_v27 = vsub.f32 2.0, %v1561_v26 }
 0x513   : > { %v1631_v55 = vsub.f32 1.0, %v1630_v54 }
 0x514   : > { %v1563_v29 = vmul.f32 %v2830_v24, %v1562_v27  ;;  %v2804_v24 = vld [vmem:[%s3952_s20] ss:$0 sm:$0xff]  ;;  %s2321_s20 = sshll.u32 %s1133_s10, 4  ;;  %s2322_s20 = int_to_ptr.vmem [resolvable:$true] %s2321_s20 }
 0x515   : > { %v1632_v56 = vmul.f32 %v2832_v53, %v1631_v55  ;;  %v1723_v26 = vadd.f32 %v2804_v24, %v1722_v25  ;;  %v2805_v27 = vld [vmem:[%s3953_s7] ss:$0 sm:$0xff]  ;;  %s2323_s7 = sshll.u32 %s2319_s3, 4  ;;  %s2324_s7 = int_to_ptr.hbm [resolvable:$true] %s2323_s7 }
 0x516   : > { %v1564_v30 = vmul.f32 %v1563_v29, %v1559_v22 }
 0x517   : > { %v1633_v57 = vadd.f32 %v2832_v53, %v1632_v56 }
 0x518   : > { %v1565_v32 = vsub.f32 2.0, %v1564_v30 }
 0x519   : > { %v3769_v58 = vsel %vm1634_vm2, %v2832_v53, %v1633_v57 }
 0x51a   : > { %v1566_v33 = vmul.f32 %v1565_v32, %v1563_v29 }
 0x51c   : > { %v1567_v35 = vmul.f32 %v2826_v15, %v1566_v33 }
 0x51e   : > { %2604 = vmatmul.msk.f32.vlgmr.msrb.gmra.mxu0 %vm1238_vm1, %v1567_v35  ;;  %v1727_v35 = vld [vmem:[#allocation11 + $0x10] sm:$0xff] }
 0x51f   : > { %1746 = vmatpush.msra.mxu0 %v1727_v35 }
 0x520   : > { %v1472_v37 = vpop.permute.xlu1 %1471 }
 0x521   : > { %1492 = vmatpush.msra.mxu1 %v1472_v37  ;;  %v1725_v37 = vld [vmem:[#allocation11] sm:$0xff] }
 0x522   : > { %2600 = vmatmul.msk.f32.vlgmr.msra.gmra.mxu1 %vm1238_vm1, %v1470_v36  ;;  %v1726_v36 = vld [vmem:[#allocation11 + $0x8] sm:$0xff] }
 0x523   : > { %1614 = vmatpush.msrb.mxu1 %v1595_v38  ;;  %1747 = vmatpush.msra.mxu0 %v1726_v36 }
 0x525   : > { %2609 = vmatpush.xpose.msk.msra.mxu1 %vm1238_vm1, %v1723_v26  ;;  %1748 = vmatpush.msra.mxu0 %v1725_v37  ;;  %v1894_v37 = vld [vmem:[#allocation13 + $0x8] sm:$0xff] }
 0x526   : > { %2608 = vmatmul.msk.f32.vlgmr.msra.gmra.mxu0 %vm1157_vm0, %v1148_v4 }
 0x57f   : > { %v1400_v42 = vpop.f32.mrf.mxu2 }
 0x580   : > { %v1424_v43 = vadd.f32 %v3749_v61, %v1400_v42 }
 0x59b   : > { %v1591_v40 = vpop.f32.mrf.mxu0 }
 0x59c   : > { %2605 = vmatmul.msk.f32.vlgmr.msrb.gmra.mxu1 %vm1238_vm1, %v1591_v40 }
 0x59d   : > { %1913 = vmatpush.msrb.mxu1 %v1894_v37  ;;  %v2810_v37 = vld [vmem:[%s3959_s2] ss:$0 sm:$0xff] }
 0x59f   : > { %v1494_v41 = vpop.f32.mrf.mxu1 }
 0x5a0   : > { %2601 = vmatmul.msk.f32.vlgmr.msra.gmra.mxu2 %vm1238_vm1, %v1494_v41 }
 0x619   : > { %v1616_v47 = vpop.f32.mrf.mxu1 }
 0x623   : > { %v1519_v44 = vpop.f32.mrf.mxu2 }
 0x624   : > { %v1522_v45 = vadd.f32 %v1519_v44, %v1424_v43 }
 0x626   : > { %v1619_v48 = vadd.f32 %v1616_v47, %v1522_v45  ;;  %v2806_v47 = vld [vmem:[%s3954_s30] ss:$0 sm:$0xff]  ;;  %s2304_s30 = scalar_lea.sflag [#allocation4], %s3668_s19 }
 0x628   : > { %v1624_v49 = vadd.f32 %v2801_v46, %v1619_v48  ;;  %v1750_v48 = vpop.f32.mrf.mxu0 }
 0x62a   : > { %v1625_v50 = vadd.f32 %v1624_v49, %v3709_v8  ;;  %v3801_v49 = vadd.f32 %v2806_v47, %v1750_v48 }
 0x62c   : > { %v1626_v51 = vsel %vm1157_vm0, %v1625_v50, 0.0  ;;  %1815 = vmatpush.msra.mxu2 %v3801_v49 }
 0x62d   : > { %1627 = vadd.xlane.f32.xlu2 %v1626_v51 }
 0x6a0   : > { %v1628_v59 = vpop.xlane.xlu2 %1627 }
 0x6a1   : > { %v1636_v60 = vmul.f32 %v3769_v58, %v1628_v59 }
 0x6a3   : > { %v1637_v61 = vsub.f32 %v1625_v50, %v1636_v60  ;;  %v1820_v50 = vld [vmem:[#allocation13] sm:$0xff] }
 0x6a5   : > { %v1638_v62 = vmul.f32 %v1637_v61, %v1637_v61 }
 0x6a7   : > { %v1639_v8 = vsel %vm1157_vm0, %v1638_v62, 0.0 }
 0x6a8   : > { %1640 = vadd.xlane.f32.xlu0 %v1639_v8 }
 0x6bc   : > { %1823 = vrot.lane.b32.xlu0 %v1723_v26, %s3286_s21 }
 0x71b   : > { %v1641_v9 = vpop.xlane.xlu0 %1640 }
 0x71c   : > { %v1642_v10 = vmul.f32 %v1641_v9, %v3769_v58 }
 0x71e   : > { %v1643_v11 = vadd.f32 1e-05, %v1642_v10 }
 0x720   : > { %2833 = vrsqrt.f32 %v1643_v11  ;;  %vm1650_vm4 = vweird.f32 %v1643_v11 }
 0x726   : > { %v2834_v12 = vpop.eup %2833 }
 0x727   : > { %v1645_v13 = vmul.f32 %v2834_v12, %v1643_v11  ;;  %vm1651_vm3 = vweird.f32 %v2834_v12 }
 0x728   : > { %vm1652_vm5 = vmor %vm1650_vm4, %vm1651_vm3 }
 0x729   : > { %v1646_v14 = vmul.f32 %v2834_v12, %v1645_v13 }
 0x72b   : > { %v1647_v15 = vmul.f32 0.5, %v1646_v14 }
 0x72d   : > { %v1648_v16 = vsub.f32 1.5, %v1647_v15 }
 0x72e   : > { %v1824_v31 = vpop.permute.xlu0 %1823 }
 0x72f   : > { %v1649_v17 = vmul.f32 %v2834_v12, %v1648_v16  ;;  %2612 = vmatpush.xpose.msk.msrb.mxu3 %vm1238_vm1, %v1824_v31 }
 0x731   : > { %v1653_v19 = vsel %vm1652_vm5, %v2834_v12, %v1649_v17 }
 0x732   : > { %v1654_v20 = vmul.f32 %v1653_v19, %v1637_v61 }
 0x734   : > { %v1658_v22 = vmul.f32 %v2802_v18, %v1654_v20 }
 0x736   : > { %v3779_v23 = vadd.f32 %v2803_v21, %v1658_v22 }
 0x738   : > { %2606 = vmatmul.msk.f32.vlgmr.msrb.gmra.mxu2 %vm1157_vm0, %v3779_v23 }
 0x739   : > { %1936 = vmatpush.msrb.mxu2 %v1820_v50 }
 0x7bb   : > { %v1691_v28 = vpop.f32.mrf.mxu2 }
 0x7bc   : > { %v1692_v29 = vadd.f32 %v2805_v27, %v1691_v28 }
 0x7be   : > { %v1753_v30 = vmul.f32 0.35355338, %v1692_v29 }
 0x7c0   : > { %2038 = vrot.lane.b32.xlu0 %v1753_v30, %s3287_s8  ;;  %2610 = vmatmul.msk.f32.vlgmr.msra.gmra.mxu1 %vm1238_vm1, %v1753_v30 }
 0x7c8   : > { %1941 = vrot.lane.b32.xlu0 %v1753_v30, %s3285_s4 }
 0x832   : > { %v2039_v44 = vpop.permute.xlu0 %2038 }
 0x83a   : > { %v1942_v46 = vpop.permute.xlu0 %1941 }
 0x83d   : > { %v1777_v32 = vpop.f32.mrf.mxu1 }
 0x83e   : > { %v1780_v33 = vsel %vm1238_vm1, %v1777_v32, -inf }
 0x83f   : > { %1781 = vmax.xlane.f32.xlu1 %v1780_v33 }
 0x858   : > { %1821 = vrot.lane.b32.xlu1 %v1753_v30, %s3286_s21 }
 0x860   : > { %1943 = vrot.lane.b32.xlu1 %v1723_v26, %s3285_s4 }
 0x8b2   : > { %v1782_v38 = vpop.xlane.xlu1 %1781 }
 0x8b3   : > { %v1783_v39 = vsub.f32 %v1777_v32, %v1782_v38  ;;  %v2013_v38 = vld [vmem:[#allocation13 + $0x10] sm:$0xff] }
 0x8b4   : > { %2032 = vmatpush.msra.mxu1 %v2013_v38 }
 0x8b5   : > { %v1784_v40 = vmul.f32 1.442695, %v1783_v39 }
 0x8b7   : > { %2835 = vpow2.f32 %v1784_v40 }
 0x8bd   : > { %v2836_v41 = vpop.eup %2835 }
 0x8be   : > { %v1786_v42 = vsel %vm1238_vm1, %v2836_v41, 0.0 }
 0x8bf   : > { %1787 = vadd.xlane.f32.xlu2 %v1786_v42 }
 0x8ca   : > { %v1822_v43 = vpop.permute.xlu1 %1821 }
 0x8cb   : > { %2613 = vmatmul.msk.f32.vlgmr.msrb.gmra.mxu3 %vm1238_vm1, %v1822_v43 }
 0x8d2   : > { %v1944_v45 = vpop.permute.xlu1 %1943 }
 0x8d3   : > { %2617 = vmatpush.xpose.msk.msra.mxu3 %vm1238_vm1, %v1944_v45 }
 0x8d6   : > { %2618 = vmatmul.msk.f32.vlgmr.msra.gmra.mxu3 %vm1238_vm1, %v1942_v46 }
 0x8d7   : > { %2040 = vrot.lane.b32.xlu2 %v1723_v26, %s3287_s8 }
 0x932   : > { %v1788_v51 = vpop.xlane.xlu2 %1787 }
 0x933   : > { %2837 = vrcp.f32 %v1788_v51 }
 0x939   : > { %v2838_v52 = vpop.eup %2837 }
 0x93a   : > { %v1790_v53 = vmul.f32 %v2838_v52, %v1788_v51  ;;  %v2041_v61 = vpop.permute.xlu2 %2040 }
 0x93c   : > { %v1791_v54 = vsub.f32 2.0, %v1790_v53 }
 0x93e   : > { %v1792_v55 = vmul.f32 %v2838_v52, %v1791_v54 }
 0x940   : > { %v1793_v56 = vmul.f32 %v1792_v55, %v1788_v51 }
 0x942   : > { %v1794_v57 = vsub.f32 2.0, %v1793_v56 }
 0x944   : > { %v1795_v59 = vmul.f32 %v1794_v57, %v1792_v55  ;;  %v2110_v57 = vld [vmem:[#allocation13 + $0x18] sm:$0xff] }
 0x946   : > { %v1796_v60 = vmul.f32 %v2836_v41, %v1795_v59 }
 0x948   : > { %2611 = vmatmul.msk.f32.vlgmr.msra.gmra.mxu2 %vm1238_vm1, %v1796_v60 }
 0x949   : > { %2621 = vmatpush.xpose.msk.msra.mxu2 %vm1238_vm1, %v2041_v61 }
 0x94e   : > { %v1846_v62 = vpop.f32.mrf.mxu3 }
 0x94f   : > { %v1849_v8 = vsel %vm1238_vm1, %v1846_v62, -inf }
 0x950   : > { %1850 = vmax.xlane.f32.xlu2 %v1849_v8  ;;  %v2807_v8 = vld [vmem:[%s3955_s12] ss:$0 sm:$0xff]  ;;  %s3139_s12 = sshra.s32 %s2324_s7, 4  ;;  %s3140_s12 = int_to_ptr.hbm [resolvable:$true] %s3139_s12 }
 0x951   : > { %p3146_p8 = scmp.lt.s32.totalorder %s3140_s12, %s3963_s6 }
 0x959   : > { %v1966_v63 = vpop.f32.mrf.mxu3 }
 0x95a   : > { %v1969_v0 = vsel %vm1238_vm1, %v1966_v63, -inf }
 0x95b   : > { %1970 = vmax.xlane.f32.xlu0 %v1969_v0 }
 0x9c3   : > { %v1851_v1 = vpop.xlane.xlu2 %1850 }
 0x9c4   : > { %v1852_v2 = vsub.f32 %v1846_v62, %v1851_v1 }
 0x9c6   : > { %v1853_v3 = vmul.f32 1.442695, %v1852_v2 }
 0x9c8   : > { %2839 = vpow2.f32 %v1853_v3 }
 0x9cb   : > { %v1817_v4 = vpop.f32.mrf.mxu2 }
 0x9cc   : > { %2616 = vmatmul.msk.f32.vlgmr.msrb.gmra.mxu2 %vm1238_vm1, %v1817_v4 }
 0x9ce   : > { %v2840_v5 = vpop.eup %2839  ;;  %v1971_v6 = vpop.xlane.xlu0 %1970 }
 0x9cf   : > { %v1972_v7 = vsub.f32 %v1966_v63, %v1971_v6  ;;  %v1855_v9 = vsel %vm1238_vm1, %v2840_v5, 0.0 }
 0x9d0   : > { %1856 = vadd.xlane.f32.xlu2 %v1855_v9 }
 0x9d1   : > { %v1973_v10 = vmul.f32 1.442695, %v1972_v7 }
 0x9d3   : > { %2841 = vpow2.f32 %v1973_v10  ;;  %v2174_v10 = vld [vmem:[#allocation14 + $0x18] sm:$0xff] }
 0x9d4   : > { %2622 = vmatmul.msk.f32.vlgmr.msra.gmra.mxu2 %vm1238_vm1, %v2039_v44 }
 0x9d9   : > { %v2842_v11 = vpop.eup %2841 }
 0x9da   : > { %v1975_v12 = vsel %vm1238_vm1, %v2842_v11, 0.0 }
 0x9db   : > { %1976 = vadd.xlane.f32.xlu0 %v1975_v12  ;;  %v2171_v12 = vld [vmem:[#allocation14] sm:$0xff] }
 0x9e8   : > { %1867 = vrot.lane.b32.xlu2 %v3801_v49, %s3286_s21  ;;  %s3961_s21 = sld [smem:[#allocation44_spill]] }
 0x9ef   : > { %1986 = vrot.lane.b32.xlu0 %v3801_v49, %s3285_s4  ;;  %s3960_s4 = sld [smem:[#allocation49_spill]] }
 0xa43   : > { %v1857_v13 = vpop.xlane.xlu2 %1856 }
 0xa44   : > { %2843 = vrcp.f32 %v1857_v13 }
 0xa4a   : > { %v2844_v14 = vpop.eup %2843 }
 0xa4b   : > { %v1859_v15 = vmul.f32 %v2844_v14, %v1857_v13  ;;  %v1868_v16 = vpop.permute.xlu2 %1867 }
 0xa4c   : > { %1888 = vmatpush.msrb.mxu0 %v1868_v16 }
 0xa4d   : > { %v1860_v17 = vsub.f32 2.0, %v1859_v15  ;;  %v2208_v15 = vld [vmem:[%s3956_s27 + $0x28] sm:$0xff] }
 0xa4e   : > { %v1977_v18 = vpop.xlane.xlu0 %1976 }
 0xa4f   : > { %v1861_v19 = vmul.f32 %v2844_v14, %v1860_v17  ;;  %2845 = vrcp.f32 %v1977_v18  ;;  %v1938_v20 = vpop.f32.mrf.mxu2  ;;  %v2209_v14 = vld [vmem:[%s3956_s27 + $0x30] sm:$0xff] }
 0xa51   : > { %v1862_v21 = vmul.f32 %v1861_v19, %v1857_v13  ;;  %v2210_v13 = vld [vmem:[%s3956_s27 + $0x38] sm:$0xff] }
 0xa52   : > { %2227 = vmatpush.msrb.mxu2 %v2210_v13 }
 0xa53   : > { %v1863_v22 = vsub.f32 2.0, %v1862_v21 }
 0xa54   : > { %2228 = vmatpush.msrb.mxu2 %v2209_v14 }
 0xa55   : > { %v2846_v24 = vpop.eup %2845  ;;  %v1864_v25 = vmul.f32 %v1863_v22, %v1861_v19 }
 0xa56   : > { %v1979_v26 = vmul.f32 %v2846_v24, %v1977_v18  ;;  %2229 = vmatpush.msrb.mxu2 %v2208_v15 }
 0xa57   : > { %v1865_v27 = vmul.f32 %v2840_v5, %v1864_v25  ;;  %v2063_v28 = vpop.f32.mrf.mxu2 }
 0xa58   : > { %v1980_v29 = vsub.f32 2.0, %v1979_v26  ;;  %v2066_v30 = vsel %vm1238_vm1, %v2063_v28, -inf }
 0xa59   : > { %2067 = vmax.xlane.f32.xlu1 %v2066_v30  ;;  %2614 = vmatmul.msk.f32.vlgmr.msrb.gmra.mxu0 %vm1238_vm1, %v1865_v27 }
 0xa5a   : > { %v1981_v31 = vmul.f32 %v2846_v24, %v1980_v29 }
 0xa5c   : > { %v1982_v32 = vmul.f32 %v1981_v31, %v1977_v18  ;;  %v2207_v18 = vld [vmem:[%s3956_s27 + $0x20] sm:$0xff] }
 0xa5d   : > { %2230 = vmatpush.msrb.mxu2 %v2207_v18 }
 0xa5e   : > { %v1983_v33 = vsub.f32 2.0, %v1982_v32 }
 0xa60   : > { %v1984_v34 = vmul.f32 %v1983_v33, %v1981_v31  ;;  %v2809_v31 = vld [vmem:[%s3958_s26] ss:$0 sm:$0xff]  ;;  %s3145_s26 = scalar_lea.hbm %s3963_s6, 16 }
 0xa61   : > { %v1987_v35 = vpop.permute.xlu0 %1986 }
 0xa62   : > { %v1985_v36 = vmul.f32 %v2842_v11, %v1984_v34  ;;  %2007 = vmatpush.msra.mxu0 %v1987_v35  ;;  %v2173_v11 = vld [vmem:[#allocation14 + $0x10] sm:$0xff]  ;;  %v2204_v35 = vld [vmem:[%s3956_s27 + $0x8] sm:$0xff] }
 0xa63   : > { %v2205_v34 = vld [vmem:[%s3956_s27 + $0x10] sm:$0xff] }
 0xa64   : > { %2619 = vmatmul.msk.f32.vlgmr.msra.gmra.mxu0 %vm1238_vm1, %v1985_v36  ;;  %v2203_v36 = vld [vmem:[%s3956_s27] sm:$0xff] }
 0xa65   : > { %2129 = vmatpush.msrb.mxu0 %v2110_v57 }
 0xacc   : > { %v2068_v39 = vpop.xlane.xlu1 %2067 }
 0xacd   : > { %v2069_v40 = vsub.f32 %v2063_v28, %v2068_v39  ;;  %v2808_v28 = vld [vmem:[%s3957_s14] ss:$0 sm:$0xff]  ;;  %s3141_s14 = scalar_lea.hbm %s3140_s12, 8 }
 0xace   : > { %p3142_p1 = scmp.ne.s32.totalorder %s3140_s12, %s3141_s14  ;;  %p3147_p13 = scmp.lt.s32.totalorder %s3145_s26, %s3141_s14 }
 0xacf   : > { %v2070_v41 = vmul.f32 1.442695, %v2069_v40 }
 0xad0   : > { %p3143_p3 = pnand %p3142_p1, %p3629_p7  ;;  %p3148_p12 = por %p3147_p13, %p3146_p8 }
 0xad1   : > { %2847 = vpow2.f32 %v2070_v41  ;;  %v2811_v41 = vld [vmem:[%s3960_s4] ss:$0 sm:$0xff] }
 0xad2   : > { %p3144_p6 = pneg %p3143_p3 }
 0xad4   : > { %p3149_p0 = pnand %p3148_p12, %p3144_p6 }
 0xad6   : > { %v1890_v42 = vpop.f32.mrf.mxu0 }
 0xad7   : > { %v2848_v43 = vpop.eup %2847  ;;  %2615 = vmatmul.msk.f32.vlgmr.msrb.gmra.mxu1 %vm1238_vm1, %v1890_v42 }
 0xad8   : > { %v2072_v44 = vsel %vm1238_vm1, %v2848_v43, 0.0  ;;  %2194 = vmatpush.msrb.mxu1 %v2174_v10 }
 0xad9   : > { %2073 = vadd.xlane.f32.xlu1 %v2072_v44 }
 0xada   : > { %2195 = vmatpush.msrb.mxu1 %v2173_v11 }
 0xae1   : > { %v2009_v45 = vpop.f32.mrf.mxu0 }
 0xae2   : > { %2620 = vmatmul.msk.f32.vlgmr.msra.gmra.mxu1 %vm1238_vm1, %v2009_v45 }
 0xaf2   : > { %2083 = vrot.lane.b32.xlu1 %v3801_v49, %s3287_s8  ;;  %s3962_s8 = sld [smem:[#allocation45_spill]] }
 0xb4c   : > { %v2074_v46 = vpop.xlane.xlu1 %2073 }
 0xb4d   : > { %2849 = vrcp.f32 %v2074_v46 }
 0xb53   : > { %v2850_v47 = vpop.eup %2849 }
 0xb54   : > { %v2076_v48 = vmul.f32 %v2850_v47, %v2074_v46  ;;  %v1915_v49 = vpop.f32.mrf.mxu1 }
 0xb55   : > { %v1939_v61 = vadd.f32 %v1938_v20, %v1915_v49  ;;  %v2206_v20 = vld [vmem:[%s3956_s27 + $0x18] sm:$0xff] }
 0xb56   : > { %v2077_v50 = vsub.f32 2.0, %v2076_v48  ;;  %2231 = vmatpush.msrb.mxu2 %v2206_v20 }
 0xb58   : > { %v2078_v51 = vmul.f32 %v2850_v47, %v2077_v50  ;;  %2232 = vmatpush.msrb.mxu2 %v2205_v34 }
 0xb5a   : > { %v2079_v52 = vmul.f32 %v2078_v51, %v2074_v46  ;;  %2233 = vmatpush.msrb.mxu2 %v2204_v35 }
 0xb5c   : > { %v2080_v53 = vsub.f32 2.0, %v2079_v52  ;;  %2234 = vmatpush.msrb.mxu2 %v2203_v36  ;;  %v2274_v52 = vld [vmem:[#allocation16 + $0x18] sm:$0xff] }
 0xb5e   : > { %v2081_v54 = vmul.f32 %v2080_v53, %v2078_v51  ;;  %v2273_v53 = vld [vmem:[#allocation16 + $0x10] sm:$0xff] }
 0xb5f   : > { %v2034_v60 = vpop.f32.mrf.mxu1 }
 0xb60   : > { %v2082_v55 = vmul.f32 %v2848_v43, %v2081_v54  ;;  %v2037_v62 = vadd.f32 %v2034_v60, %v1939_v61  ;;  %v2272_v54 = vld [vmem:[#allocation16 + $0x8] sm:$0xff] }
 0xb64   : > { %v2084_v56 = vpop.permute.xlu1 %2083 }
 0xb65   : > { %2104 = vmatpush.msrb.mxu3 %v2084_v56 }
 0xb66   : > { %2623 = vmatmul.msk.f32.vlgmr.msrb.gmra.mxu3 %vm1238_vm1, %v2082_v55  ;;  %v2271_v55 = vld [vmem:[#allocation16] sm:$0xff] }
 0xb67   : > { %2294 = vmatpush.msra.mxu3 %v2274_v52 }
 0xb69   : > { %2295 = vmatpush.msra.mxu3 %v2273_v53 }
 0xb6b   : > { %2296 = vmatpush.msra.mxu3 %v2272_v54 }
 0xb6d   : > { %2297 = vmatpush.msra.mxu3 %v2271_v55 }
 0xbe9   : > { %v2106_v59 = vpop.f32.mrf.mxu3 }
 0xbea   : > { %2624 = vmatmul.msk.f32.vlgmr.msrb.gmra.mxu0 %vm1238_vm1, %v2106_v59 }
 0xc67   : > { %v2131_v63 = vpop.f32.mrf.mxu0 }
 0xc68   : > { %v2134_v0 = vadd.f32 %v2131_v63, %v2037_v62 }
 0xc6a   : > { %v2139_v1 = vadd.f32 %v2807_v8, %v2134_v0  ;;  %v2812_v0 = vld [vmem:[%s3961_s21] ss:$0 sm:$0xff] }
 0xc6c   : > { %v2140_v2 = vadd.f32 %v2139_v1, %v3779_v23  ;;  %v2172_v23 = vld [vmem:[#allocation14 + $0x8] sm:$0xff] }
 0xc6d   : > { %2196 = vmatpush.msrb.mxu1 %v2172_v23 }
 0xc6e   : > { %v2141_v3 = vsel %vm1157_vm0, %v2140_v2, 0.0 }
 0xc6f   : > { %2142 = vadd.xlane.f32.xlu2 %v2141_v3  ;;  %2197 = vmatpush.msrb.mxu1 %v2171_v12  ;;  %v2813_v3 = vld [vmem:[%s3962_s8] ss:$0 sm:$0xff] }
 0xce2   : > { %v2143_v4 = vpop.xlane.xlu2 %2142 }
 0xce3   : > { %v2144_v5 = vmul.f32 %v2143_v4, %v3769_v58 }
 0xce5   : > { %v2145_v6 = vsub.f32 %v2140_v2, %v2144_v5 }
 0xce7   : > { %v2146_v7 = vmul.f32 %v2145_v6, %v2145_v6 }
 0xce9   : > { %v2147_v9 = vsel %vm1157_vm0, %v2146_v7, 0.0 }
 0xcea   : > { %2148 = vadd.xlane.f32.xlu0 %v2147_v9 }
 0xd5d   : > { %v2149_v16 = vpop.xlane.xlu0 %2148 }
 0xd5e   : > { %v2150_v17 = vmul.f32 %v2149_v16, %v3769_v58 }
 0xd60   : > { %v2151_v19 = vadd.f32 1e-05, %v2150_v17 }
 0xd62   : > { %2851 = vrsqrt.f32 %v2151_v19  ;;  %vm2158_vm7 = vweird.f32 %v2151_v19 }
 0xd68   : > { %v2852_v21 = vpop.eup %2851 }
 0xd69   : > { %v2153_v22 = vmul.f32 %v2852_v21, %v2151_v19  ;;  %vm2159_vm6 = vweird.f32 %v2852_v21 }
 0xd6a   : > { %vm2160_vm8 = vmor %vm2158_vm7, %vm2159_vm6 }
 0xd6b   : > { %v2154_v24 = vmul.f32 %v2852_v21, %v2153_v22 }
 0xd6d   : > { %v2155_v25 = vmul.f32 0.5, %v2154_v24 }
 0xd6f   : > { %v2156_v26 = vsub.f32 1.5, %v2155_v25 }
 0xd71   : > { %v2157_v27 = vmul.f32 %v2852_v21, %v2156_v26 }
 0xd73   : > { %v2161_v29 = vsel %vm2160_vm8, %v2852_v21, %v2157_v27 }
 0xd74   : > { %v2162_v30 = vmul.f32 %v2161_v29, %v2145_v6 }
 0xd76   : > { %v2166_v32 = vmul.f32 %v2808_v28, %v2162_v30 }
 0xd78   : > { %v2170_v33 = vadd.f32 %v2809_v31, %v2166_v32 }
 0xd7a   : > { %2625 = vmatmul.msk.f32.vlgmr.msrb.gmra.mxu1 %vm1157_vm0, %v2170_v33 }
 0xdf7   : > { %v2199_v38 = vpop.f32.mrf.mxu1 }
 0xdf8   : > { %v2200_v39 = vadd.f32 %v2810_v37, %v2199_v38 }
 0xdfa   : > { %v2202_v40 = vmax.f32 %v2200_v39, 0.0 }
 0xdfc   : > { %2626 = vmatmul.msk.f32.vlgmr.msrb.gmra.mxu2 %vm2215_vm9, %v2202_v40 }
 0xe7f   : > { %v2236_v42 = vpop.f32.mrf.mxu2 }
 0xe80   : > { %v2237_v43 = vadd.f32 %v2811_v41, %v2236_v42 }
 0xe82   : > { %v2239_v44 = vadd.f32 %v2237_v43, %v2170_v33 }
 0xe84   : > { %v2240_v45 = vsel %vm1157_vm0, %v2239_v44, 0.0 }
 0xe85   : > { %2241 = vadd.xlane.f32.xlu1 %v2240_v45 }
 0xef8   : > { %v2242_v46 = vpop.xlane.xlu1 %2241 }
 0xef9   : > { %v2243_v47 = vmul.f32 %v2242_v46, %v3769_v58 }
 0xefb   : > { %v2244_v48 = vsub.f32 %v2239_v44, %v2243_v47 }
 0xefd   : > { %v2245_v50 = vmul.f32 %v2244_v48, %v2244_v48 }
 0xeff   : > { %v2246_v51 = vsel %vm1157_vm0, %v2245_v50, 0.0 }
 0xf00   : > { %2247 = vadd.xlane.f32.xlu2 %v2246_v51 }
 0xf73   : > { %v2248_v56 = vpop.xlane.xlu2 %2247 }
 0xf74   : > { %v2249_v57 = vmul.f32 %v2248_v56, %v3769_v58 }
 0xf76   : > { %v2250_v59 = vadd.f32 1e-05, %v2249_v57 }
 0xf78   : > { %2853 = vrsqrt.f32 %v2250_v59  ;;  %vm2257_vm11 = vweird.f32 %v2250_v59 }
 0xf7e   : > { %v2854_v49 = vpop.eup %2853 }
 0xf7f   : > { %v2252_v60 = vmul.f32 %v2854_v49, %v2250_v59  ;;  %vm2258_vm10 = vweird.f32 %v2854_v49 }
 0xf80   : > { %vm2259_vm12 = vmor %vm2257_vm11, %vm2258_vm10 }
 0xf81   : > { %v2253_v61 = vmul.f32 %v2854_v49, %v2252_v60 }
 0xf83   : > { %v2254_v62 = vmul.f32 0.5, %v2253_v61 }
 0xf85   : > { %v2255_v8 = vsub.f32 1.5, %v2254_v62 }
 0xf87   : > { %v2256_v63 = vmul.f32 %v2854_v49, %v2255_v8 }
 0xf89   : > { %v2260_v1 = vsel %vm2259_vm12, %v2854_v49, %v2256_v63 }
 0xf8a   : > { %v2261_v2 = vmul.f32 %v2260_v1, %v2244_v48 }
 0xf8c   : > { %v2265_v58 = vmul.f32 %v2812_v0, %v2261_v2 }
 0xf8e   : > { %v2269_v4 = vadd.f32 %v2813_v3, %v2265_v58 }
 0xf90   : > { %2627 = vmatmul.msk.f32.vlgmr.msra.gmra.mxu3 %vm1157_vm0, %v2269_v4  ;;  %2270 = vst.msk [vmem:[%s1133_s10] sm:$0xff] %vm1157_vm0, %v2269_v4 }
 0xf91   : > { %3152 = shalt.err (!%p3149_p0)
}
 0xf92   : > { %s3964_s1 = sld [smem:[#allocation53_spill]]  ;;  %s1140_s21 = scalar_lea.vmem [#allocation18], %s3671_s24 }
 0xf93   : > { %s3965_s2 = sld [smem:[#allocation51_spill]]  ;;  %s2335_s8 = sshll.u32 %s1140_s21, 4  ;;  %s2336_s8 = int_to_ptr.vmem [resolvable:$true] %s2335_s8 }
 0xf94   : > { %2666 = dma.vmem_to_hbm [thread:$0]  (%p3629_p7), %s2322_s20, 128, %s2324_s7, %s2304_s30  }
 0xf95   : > { %s2309_s3 = scalar_lea.sflag [#allocation19], %s3668_s19 }
 0xf98   : > { %s2333_s4 = scalar_lea.hbm %s3964_s1, %s2630_s16  ;;  %s3173_s16 = scalar_lea.hbm %s3964_s1, 16 }
 0xf99   : > { %v2814_v5 = vld [vmem:[%s3965_s2] ss:$0 sm:$0xff]  ;;  %s2337_s10 = sshll.u32 %s2333_s4, 4  ;;  %s2338_s10 = int_to_ptr.hbm [resolvable:$true] %s2337_s10 }
 0xf9a   : > { %s3167_s12 = sshra.s32 %s2338_s10, 4  ;;  %s3168_s12 = int_to_ptr.hbm [resolvable:$true] %s3167_s12 }
 0xf9b   : > { %s3169_s14 = scalar_lea.hbm %s3168_s12, 8  ;;  %p3174_p9 = scmp.lt.s32.totalorder %s3168_s12, %s3964_s1 }
 0xf9c   : > { %p3170_p5 = scmp.ne.s32.totalorder %s3168_s12, %s3169_s14  ;;  %p3175_p10 = scmp.lt.s32.totalorder %s3173_s16, %s3169_s14 }
 0xf9e   : > { %p3171_p2 = pnand %p3170_p5, %p3629_p7  ;;  %p3176_p1 = por %p3175_p10, %p3174_p9 }
 0xfa0   : > { %p3172_p4 = pneg %p3171_p2 }
 0xfa2   : > { %p3177_p3 = pnand %p3176_p1, %p3172_p4 }
0x1013   : > { %v2299_v6 = vpop.f32.mrf.mxu3 }
0x1014   : > { %v2300_v7 = vadd.f32 %v2814_v5, %v2299_v6 }
0x1016   : > { %2302 = vst [vmem:[%s1140_s21] sm:$0xff] %v2300_v7 }
0x1017   : > { %3180 = shalt.err (!%p3177_p3)
}
0x1018   : > { %2667 = dma.vmem_to_hbm [thread:$0]  (%p3629_p7), %s2336_s8, 128, %s2338_s10, %s2309_s3  }
0x1019 PF: > { %s2349_s19 = sand.u32 1, %s3231_s22   ;;  %p3966_p6 = scmp.ge.s32.totalorder %s3243_s28, 2 }
0x101a   : > { %s2350_s24 = scalar_lea.sflag [#allocation4], %s2349_s19 }
0x101b   : > { %p2700_p8 = pnand %p3966_p6, %p3635_p11 }
0x101d   : > { %p2701_p13 = pneg %p2700_p8 }
0x101f   : > { %3222 = dma.done.wait (%p2701_p13), %s2350_s24, 128  }
0x1020   : > { %3224 = vsyncadd (%p2701_p13), %s2350_s24, 4294967168  ;;  %s2360_s20 = scalar_lea.sflag [#allocation19], %s2349_s19 }
0x1021   : > { %3226 = dma.done.wait (%p2701_p13), %s2360_s20, 128  }
0x1022   : > { %3228 = vsyncadd (%p2701_p13), %s2360_s20, 4294967168  ;;  %s3967_s7 = sld [smem:[#allocation54_spill]]  ;;  %p86_p7 = scmp.ge.s32.totalorder %s3605_s15, 4  }
0x1023   : > { %s3968_s26 = sld [smem:[#allocation55_spill]]  ;;  %s3969_s22 = smov %s3235_s23 }
0x1024   : > { %s3971_s28 = smov %s3605_s15  ;;  %88 = sbr.rel (!%p86_p7) target bundleno = 75 (0x4b), region = 280 }
0x1028   : > { %s3970_s23 = smov %s3967_s7 }
0x1029   :  { %2366 = vsyncpa [#allocation3], 1 }
0x102a   :  { %2368 = vsyncpa [#allocation3 + $0x1], 1 }
0x102b   :  { %2369 = vsyncpa [#allocation6], 1 }
0x102c   :  { %2371 = vsyncpa [#allocation6 + $0x1], 1 }
0x102d   :  { %2372 = vsyncpa [#allocation9], 1 }
0x102e   :  { %2373 = vsyncpa [#allocation12], 1 }
0x102f   :  { %2374 = vsyncpa [#allocation15], 1 }
0x1030   :  { %2375 = vsyncpa [#allocation4], 1 }
0x1031   :  { %2377 = vsyncpa [#allocation4 + $0x1], 1 }
0x1032   :  { %2378 = vsyncpa [#allocation19], 1 }
0x1033   :  { %2380 = vsyncpa [#allocation19 + $0x1], 1 }

</bundles_post_ra>
